<compile_context>
chip_gen: v5e
topology: v5e:2x2
jax: 0.10.0
libtpu: 0.0.40
codegen_flags: <defaults>
</compile_context>

<pallas_src>
import functools

import jax
import jax.numpy as jnp
from jax.experimental import pallas as pl
from jax.experimental.pallas import tpu as pltpu


B_TILE = 8      # batch rows per grid step (sublane tile)
C_PAD = 128     # lane-dense fc output width (real class_num sliced in wrapper)


def _lstm_cell(pi, pf, pg, po, c):
    """One LSTM cell update from per-gate pre-activations (PyTorch equations)."""
    i = jax.nn.sigmoid(pi)
    f = jax.nn.sigmoid(pf)
    g = jnp.tanh(pg)
    o = jax.nn.sigmoid(po)
    c_new = f * c + i * g
    h_new = o * jnp.tanh(c_new)
    return h_new, c_new


def bilstm_fc_kernel(x_ref, wih_f_ref, whh_f_ref, b_f_ref,
                     wih_b_ref, b_b_ref,
                     wfc_f_ref, wfc_b_ref, b_fc_ref, out_ref):
    # x_ref:     (1, T*Bt, E)  bf16   time-major rows: row = t*Bt + b
    # wih_f_ref: (4, E, H)     bf16   per-gate forward input weights  [i,f,g,o]
    # whh_f_ref: (4, H, H)     bf16   per-gate forward hidden weights
    # b_f_ref:   (4, 1, H)     f32    per-gate forward bias (b_ih + b_hh)
    # wih_b_ref: (4, E, H)     bf16   per-gate reverse input weights
    # b_b_ref:   (4, 1, H)     f32
    # wfc_f_ref: (H, C_PAD)    bf16   fc weight rows for the forward half
    # wfc_b_ref: (H, C_PAD)    bf16   fc weight rows for the backward half
    # b_fc_ref:  (1, C_PAD)    f32
    # out_ref:   (Bt, C_PAD)   f32
    Bt = out_ref.shape[0]
    H = whh_f_ref.shape[-1]
    T = x_ref.shape[1] // Bt

    x = x_ref[0]                                                 # (T*Bt, E)

    def in_proj(k, w_ref, b_ref, rows):
        return (jnp.dot(rows, w_ref[k], preferred_element_type=jnp.float32)
                + b_ref[k])

    # Hoisted input projection for the forward direction: one matmul per gate
    # over all timesteps (off the serial critical path).
    xp = [in_proj(k, wih_f_ref, b_f_ref, x) for k in range(4)]   # 4 x (T*Bt, H)
    whh = [whh_f_ref[k] for k in range(4)]                       # 4 x (H, H)

    # Forward recurrence, fully unrolled; only h @ W_hh stays per-step.
    h = jnp.zeros((Bt, H), jnp.float32)
    c = jnp.zeros((Bt, H), jnp.float32)
    for t in range(T):
        r0 = t * Bt                                              # static, 8-aligned
        hb = h.astype(jnp.bfloat16)
        pre = [xp[k][r0:r0 + Bt]
               + jnp.dot(hb, whh[k], preferred_element_type=jnp.float32)
               for k in range(4)]
        h, c = _lstm_cell(pre[0], pre[1], pre[2], pre[3], c)

    # Backward direction: lstm_out[:, -1, H:] of a PyTorch bi-LSTM is the
    # reverse LSTM's output at the last timestep, i.e. exactly one cell step
    # on x[T-1] from the zero state -> no h @ W_hh_reverse matmul needed.
    x_last = x[(T - 1) * Bt:, :]                                 # (Bt, E)
    pre_b = [in_proj(k, wih_b_ref, b_b_ref, x_last) for k in range(4)]
    zeros = jnp.zeros((Bt, H), jnp.float32)
    h_b, _ = _lstm_cell(pre_b[0], pre_b[1], pre_b[2], pre_b[3], zeros)

    # dropout: eval-mode identity (inference).
    # fc with split weights (avoids a lane-concat of two 32-lane fragments).
    out_ref[...] = (
        jnp.dot(h.astype(jnp.bfloat16), wfc_f_ref[...],
                preferred_element_type=jnp.float32)
        + jnp.dot(h_b.astype(jnp.bfloat16), wfc_b_ref[...],
                  preferred_element_type=jnp.float32)
        + b_fc_ref[...])


def prepare_kernel_params(params, hidden_dim, class_num):
    """PyTorch-layout params -> kernel layout (per-gate split, bf16, padded fc)."""
    H, C = hidden_dim, class_num

    def split_ih(w):            # (4H, E) -> (4, E, H)
        e = w.shape[1]
        return jnp.transpose(w.reshape(4, H, e), (0, 2, 1)).astype(jnp.bfloat16)

    def split_hh(w):            # (4H, H) -> (4, H, H)
        return jnp.transpose(w.reshape(4, H, H), (0, 2, 1)).astype(jnp.bfloat16)

    def split_b(b_ih, b_hh):    # -> (4, 1, H)
        return (b_ih + b_hh).astype(jnp.float32).reshape(4, 1, H)

    def pad_fc(w_half):         # (C, H) -> (H, C_PAD), lane-dense
        w = jnp.zeros((H, C_PAD), jnp.float32).at[:, :C].set(w_half.T)
        return w.astype(jnp.bfloat16)

    fc_w = params["fc_w"]                                        # (C, 2H)
    b_fc = jnp.zeros((1, C_PAD), jnp.float32).at[0, :C].set(params["fc_b"])

    return {
        "wih_f": split_ih(params["weight_ih_l0"]),
        "whh_f": split_hh(params["weight_hh_l0"]),
        "b_f": split_b(params["bias_ih_l0"], params["bias_hh_l0"]),
        "wih_b": split_ih(params["weight_ih_l0_rev"]),
        "b_b": split_b(params["bias_ih_l0_rev"], params["bias_hh_l0_rev"]),
        # weight_hh_l0_rev intentionally unused: reverse dir starts from h0 == 0
        "wfc_f": pad_fc(fc_w[:, :H]),
        "wfc_b": pad_fc(fc_w[:, H:]),
        "b_fc": b_fc,
    }


@functools.partial(jax.jit, static_argnames=("hidden_dim", "class_num"))
def lstm_forward(tokens, params, *, hidden_dim, class_num):
    B, T = tokens.shape
    E = params["embed"].shape[1]
    H, C = hidden_dim, class_num

    kp = prepare_kernel_params(params, H, C)

    # Embedding gather directly in time-major order (no separate transpose).
    x_tm = params["embed"][tokens.T].astype(jnp.bfloat16)        # (T, B, E)

    # Pad batch up to a multiple of the sublane tile and group into batch tiles.
    B_pad = ((B + B_TILE - 1) // B_TILE) * B_TILE
    G = B_pad // B_TILE
    x_tm = jnp.pad(x_tm, ((0, 0), (0, B_pad - B), (0, 0)))
    # (T, B_pad, E) -> (G, T*B_TILE, E); rows within a tile are t*B_TILE + b
    x_grp = jnp.reshape(
        jnp.transpose(jnp.reshape(x_tm, (T, G, B_TILE, E)), (1, 0, 2, 3)),
        (G, T * B_TILE, E))

    const3 = lambda g: (0, 0, 0)
    const2 = lambda g: (0, 0)
    out = pl.pallas_call(
        bilstm_fc_kernel,
        out_shape=jax.ShapeDtypeStruct((B_pad, C_PAD), jnp.float32),
        grid=(G,),
        in_specs=[
            pl.BlockSpec((1, T * B_TILE, E), lambda g: (g, 0, 0)),
            pl.BlockSpec((4, E, H), const3),
            pl.BlockSpec((4, H, H), const3),
            pl.BlockSpec((4, 1, H), const3),
            pl.BlockSpec((4, E, H), const3),
            pl.BlockSpec((4, 1, H), const3),
            pl.BlockSpec((H, C_PAD), const2),
            pl.BlockSpec((H, C_PAD), const2),
            pl.BlockSpec((1, C_PAD), const2),
        ],
        out_specs=pl.BlockSpec((B_TILE, C_PAD), lambda g: (g, 0)),
        compiler_params=pltpu.CompilerParams(
            dimension_semantics=("parallel",)),
    )(x_grp, kp["wih_f"], kp["whh_f"], kp["b_f"],
      kp["wih_b"], kp["b_b"], kp["wfc_f"], kp["wfc_b"], kp["b_fc"])

    return out[:B, :C]


def init_params(key, vocab, embed_dim, hidden_dim, class_num):
    H, E, C = hidden_dim, embed_dim, class_num
    ks = jax.random.split(key, 11)
    kb = 1.0 / float(jnp.sqrt(jnp.float32(H)))
    fb = 1.0 / float(jnp.sqrt(jnp.float32(2 * H)))
    u = lambda k, shape, b: jax.random.uniform(k, shape, jnp.float32, -b, b)
    return {
        "embed": jax.random.normal(ks[0], (vocab, E), jnp.float32),
        # PyTorch nn.LSTM parameter layout, gate order [i, f, g, o]
        "weight_ih_l0": u(ks[1], (4 * H, E), kb),
        "weight_hh_l0": u(ks[2], (4 * H, H), kb),
        "bias_ih_l0": u(ks[3], (4 * H,), kb),
        "bias_hh_l0": u(ks[4], (4 * H,), kb),
        "weight_ih_l0_rev": u(ks[5], (4 * H, E), kb),
        "weight_hh_l0_rev": u(ks[6], (4 * H, H), kb),   # unused at last step (h0==0)
        "bias_ih_l0_rev": u(ks[7], (4 * H,), kb),
        "bias_hh_l0_rev": u(ks[8], (4 * H,), kb),
        # nn.Linear(2H -> class_num)
        "fc_w": u(ks[9], (C, 2 * H), fb),
        "fc_b": u(ks[10], (C,), fb),
    }


if __name__ == "__main__":
    # args: embed_num=100, embed_dim=32, hidden_dim=32, class_num=4, dropout=0.5
    VOCAB, EMBED, HIDDEN, CLASSES = 100, 32, 32, 4
    B, T = 2, 8

    key = jax.random.PRNGKey(0)
    k_param, k_tok = jax.random.split(key)
    params = init_params(k_param, VOCAB, EMBED, HIDDEN, CLASSES)
    tokens = jax.random.randint(k_tok, (B, T), 0, VOCAB, dtype=jnp.int32)

    # TODO(synk): dropout is eval-mode identity; kernel is inference-only.
    logits = lstm_forward(tokens, params, hidden_dim=HIDDEN, class_num=CLASSES)
    jax.block_until_ready(logits)
    assert logits.shape == (B, CLASSES)
    assert bool(jnp.all(jnp.isfinite(logits)))
    print("KERNEL_OK")
</pallas_src>

<mosaic_0001>
module attributes {stable_mosaic.version = 11 : i64} {
  func.func @bilstm_fc_kernel(%arg0: i32, %arg1: memref<1x64x32xbf16, #tpu.memory_space<vmem>>, %arg2: memref<4x32x32xbf16, #tpu.memory_space<vmem>>, %arg3: memref<4x32x32xbf16, #tpu.memory_space<vmem>>, %arg4: memref<4x1x32xf32, #tpu.memory_space<vmem>>, %arg5: memref<4x32x32xbf16, #tpu.memory_space<vmem>>, %arg6: memref<4x1x32xf32, #tpu.memory_space<vmem>>, %arg7: memref<32x128xbf16, #tpu.memory_space<vmem>>, %arg8: memref<32x128xbf16, #tpu.memory_space<vmem>>, %arg9: memref<1x128xf32, #tpu.memory_space<vmem>>, %arg10: memref<8x128xf32, #tpu.memory_space<vmem>>) attributes {dimension_semantics = [#tpu.dimension_semantics<parallel>], iteration_bounds = array<i64: 1>, scalar_prefetch = 0 : i64, scratch_operands = 0 : i64, tpu.core_type = #tpu.core_type<tc>, window_params = [{transform_indices = @transform_0, window_bounds = array<i64: 1, 64, 32>}, {pipeline_mode = #tpu.pipeline_mode<synchronous>, transform_indices = @transform_1, window_bounds = array<i64: 4, 32, 32>}, {pipeline_mode = #tpu.pipeline_mode<synchronous>, transform_indices = @transform_2, window_bounds = array<i64: 4, 32, 32>}, {pipeline_mode = #tpu.pipeline_mode<synchronous>, transform_indices = @transform_3, window_bounds = array<i64: 4, 1, 32>}, {pipeline_mode = #tpu.pipeline_mode<synchronous>, transform_indices = @transform_4, window_bounds = array<i64: 4, 32, 32>}, {pipeline_mode = #tpu.pipeline_mode<synchronous>, transform_indices = @transform_5, window_bounds = array<i64: 4, 1, 32>}, {pipeline_mode = #tpu.pipeline_mode<synchronous>, transform_indices = @transform_6, window_bounds = array<i64: 32, 128>}, {pipeline_mode = #tpu.pipeline_mode<synchronous>, transform_indices = @transform_7, window_bounds = array<i64: 32, 128>}, {pipeline_mode = #tpu.pipeline_mode<synchronous>, transform_indices = @transform_8, window_bounds = array<i64: 1, 128>}, {transform_indices = @transform_9, window_bounds = array<i64: 8, 128>}]} {
    %c0 = arith.constant 0 : index
    %c0_0 = arith.constant 0 : index
    %c0_1 = arith.constant 0 : index
    %0 = vector.load %arg1[%c0, %c0_0, %c0_1] : memref<1x64x32xbf16, #tpu.memory_space<vmem>>, vector<1x64x32xbf16>
    %1 = vector.shape_cast %0 : vector<1x64x32xbf16> to vector<64x32xbf16>
    %c0_2 = arith.constant 0 : index
    %c0_3 = arith.constant 0 : index
    %c0_4 = arith.constant 0 : index
    %2 = vector.load %arg2[%c0_2, %c0_3, %c0_4] : memref<4x32x32xbf16, #tpu.memory_space<vmem>>, vector<1x32x32xbf16>
    %3 = vector.shape_cast %2 : vector<1x32x32xbf16> to vector<32x32xbf16>
    %cst = arith.constant dense<0.000000e+00> : vector<64x32xf32>
    %4 = tpu.matmul %1, %3, %cst {dimension_numbers = #tpu.dot_dimension_numbers<[1], [0], [0], [1], [0, 0, 1, 1], [], []>} : vector<64x32xbf16>, vector<32x32xbf16>, vector<64x32xf32> -> vector<64x32xf32>
    %c0_5 = arith.constant 0 : index
    %c0_6 = arith.constant 0 : index
    %c0_7 = arith.constant 0 : index
    %5 = vector.load %arg4[%c0_5, %c0_6, %c0_7] : memref<4x1x32xf32, #tpu.memory_space<vmem>>, vector<1x1x32xf32>
    %6 = vector.shape_cast %5 : vector<1x1x32xf32> to vector<1x32xf32>
    %7 = vector.broadcast %6 : vector<1x32xf32> to vector<64x32xf32>
    %8 = arith.addf %4, %7 : vector<64x32xf32>
    %c1 = arith.constant 1 : index
    %c0_8 = arith.constant 0 : index
    %c0_9 = arith.constant 0 : index
    %9 = vector.load %arg2[%c1, %c0_8, %c0_9] : memref<4x32x32xbf16, #tpu.memory_space<vmem>>, vector<1x32x32xbf16>
    %10 = vector.shape_cast %9 : vector<1x32x32xbf16> to vector<32x32xbf16>
    %cst_10 = arith.constant dense<0.000000e+00> : vector<64x32xf32>
    %11 = tpu.matmul %1, %10, %cst_10 {dimension_numbers = #tpu.dot_dimension_numbers<[1], [0], [0], [1], [0, 0, 1, 1], [], []>} : vector<64x32xbf16>, vector<32x32xbf16>, vector<64x32xf32> -> vector<64x32xf32>
    %c1_11 = arith.constant 1 : index
    %c0_12 = arith.constant 0 : index
    %c0_13 = arith.constant 0 : index
    %12 = vector.load %arg4[%c1_11, %c0_12, %c0_13] : memref<4x1x32xf32, #tpu.memory_space<vmem>>, vector<1x1x32xf32>
    %13 = vector.shape_cast %12 : vector<1x1x32xf32> to vector<1x32xf32>
    %14 = vector.broadcast %13 : vector<1x32xf32> to vector<64x32xf32>
    %15 = arith.addf %11, %14 : vector<64x32xf32>
    %c2 = arith.constant 2 : index
    %c0_14 = arith.constant 0 : index
    %c0_15 = arith.constant 0 : index
    %16 = vector.load %arg2[%c2, %c0_14, %c0_15] : memref<4x32x32xbf16, #tpu.memory_space<vmem>>, vector<1x32x32xbf16>
    %17 = vector.shape_cast %16 : vector<1x32x32xbf16> to vector<32x32xbf16>
    %cst_16 = arith.constant dense<0.000000e+00> : vector<64x32xf32>
    %18 = tpu.matmul %1, %17, %cst_16 {dimension_numbers = #tpu.dot_dimension_numbers<[1], [0], [0], [1], [0, 0, 1, 1], [], []>} : vector<64x32xbf16>, vector<32x32xbf16>, vector<64x32xf32> -> vector<64x32xf32>
    %c2_17 = arith.constant 2 : index
    %c0_18 = arith.constant 0 : index
    %c0_19 = arith.constant 0 : index
    %19 = vector.load %arg4[%c2_17, %c0_18, %c0_19] : memref<4x1x32xf32, #tpu.memory_space<vmem>>, vector<1x1x32xf32>
    %20 = vector.shape_cast %19 : vector<1x1x32xf32> to vector<1x32xf32>
    %21 = vector.broadcast %20 : vector<1x32xf32> to vector<64x32xf32>
    %22 = arith.addf %18, %21 : vector<64x32xf32>
    %c3 = arith.constant 3 : index
    %c0_20 = arith.constant 0 : index
    %c0_21 = arith.constant 0 : index
    %23 = vector.load %arg2[%c3, %c0_20, %c0_21] : memref<4x32x32xbf16, #tpu.memory_space<vmem>>, vector<1x32x32xbf16>
    %24 = vector.shape_cast %23 : vector<1x32x32xbf16> to vector<32x32xbf16>
    %cst_22 = arith.constant dense<0.000000e+00> : vector<64x32xf32>
    %25 = tpu.matmul %1, %24, %cst_22 {dimension_numbers = #tpu.dot_dimension_numbers<[1], [0], [0], [1], [0, 0, 1, 1], [], []>} : vector<64x32xbf16>, vector<32x32xbf16>, vector<64x32xf32> -> vector<64x32xf32>
    %c3_23 = arith.constant 3 : index
    %c0_24 = arith.constant 0 : index
    %c0_25 = arith.constant 0 : index
    %26 = vector.load %arg4[%c3_23, %c0_24, %c0_25] : memref<4x1x32xf32, #tpu.memory_space<vmem>>, vector<1x1x32xf32>
    %27 = vector.shape_cast %26 : vector<1x1x32xf32> to vector<1x32xf32>
    %28 = vector.broadcast %27 : vector<1x32xf32> to vector<64x32xf32>
    %29 = arith.addf %25, %28 : vector<64x32xf32>
    %c0_26 = arith.constant 0 : index
    %c0_27 = arith.constant 0 : index
    %c0_28 = arith.constant 0 : index
    %30 = vector.load %arg3[%c0_26, %c0_27, %c0_28] : memref<4x32x32xbf16, #tpu.memory_space<vmem>>, vector<1x32x32xbf16>
    %31 = vector.shape_cast %30 : vector<1x32x32xbf16> to vector<32x32xbf16>
    %c1_29 = arith.constant 1 : index
    %c0_30 = arith.constant 0 : index
    %c0_31 = arith.constant 0 : index
    %32 = vector.load %arg3[%c1_29, %c0_30, %c0_31] : memref<4x32x32xbf16, #tpu.memory_space<vmem>>, vector<1x32x32xbf16>
    %33 = vector.shape_cast %32 : vector<1x32x32xbf16> to vector<32x32xbf16>
    %c2_32 = arith.constant 2 : index
    %c0_33 = arith.constant 0 : index
    %c0_34 = arith.constant 0 : index
    %34 = vector.load %arg3[%c2_32, %c0_33, %c0_34] : memref<4x32x32xbf16, #tpu.memory_space<vmem>>, vector<1x32x32xbf16>
    %35 = vector.shape_cast %34 : vector<1x32x32xbf16> to vector<32x32xbf16>
    %c3_35 = arith.constant 3 : index
    %c0_36 = arith.constant 0 : index
    %c0_37 = arith.constant 0 : index
    %36 = vector.load %arg3[%c3_35, %c0_36, %c0_37] : memref<4x32x32xbf16, #tpu.memory_space<vmem>>, vector<1x32x32xbf16>
    %37 = vector.shape_cast %36 : vector<1x32x32xbf16> to vector<32x32xbf16>
    %cst_38 = arith.constant 0.000000e+00 : f32
    %38 = vector.broadcast %cst_38 : f32 to vector<8x32xf32>
    %cst_39 = arith.constant 0.000000e+00 : f32
    %39 = vector.broadcast %cst_39 : f32 to vector<8x32xf32>
    %40 = arith.truncf %38 : vector<8x32xf32> to vector<8x32xbf16>
    %41 = vector.extract_strided_slice %8 {offsets = [0, 0], sizes = [8, 32], strides = [1, 1]} : vector<64x32xf32> to vector<8x32xf32>
    %cst_40 = arith.constant dense<0.000000e+00> : vector<8x32xf32>
    %42 = tpu.matmul %40, %31, %cst_40 {dimension_numbers = #tpu.dot_dimension_numbers<[1], [0], [0], [1], [0, 0, 1, 1], [], []>} : vector<8x32xbf16>, vector<32x32xbf16>, vector<8x32xf32> -> vector<8x32xf32>
    %43 = arith.addf %41, %42 : vector<8x32xf32>
    %44 = vector.extract_strided_slice %15 {offsets = [0, 0], sizes = [8, 32], strides = [1, 1]} : vector<64x32xf32> to vector<8x32xf32>
    %cst_41 = arith.constant dense<0.000000e+00> : vector<8x32xf32>
    %45 = tpu.matmul %40, %33, %cst_41 {dimension_numbers = #tpu.dot_dimension_numbers<[1], [0], [0], [1], [0, 0, 1, 1], [], []>} : vector<8x32xbf16>, vector<32x32xbf16>, vector<8x32xf32> -> vector<8x32xf32>
    %46 = arith.addf %44, %45 : vector<8x32xf32>
    %47 = vector.extract_strided_slice %22 {offsets = [0, 0], sizes = [8, 32], strides = [1, 1]} : vector<64x32xf32> to vector<8x32xf32>
    %cst_42 = arith.constant dense<0.000000e+00> : vector<8x32xf32>
    %48 = tpu.matmul %40, %35, %cst_42 {dimension_numbers = #tpu.dot_dimension_numbers<[1], [0], [0], [1], [0, 0, 1, 1], [], []>} : vector<8x32xbf16>, vector<32x32xbf16>, vector<8x32xf32> -> vector<8x32xf32>
    %49 = arith.addf %47, %48 : vector<8x32xf32>
    %50 = vector.extract_strided_slice %29 {offsets = [0, 0], sizes = [8, 32], strides = [1, 1]} : vector<64x32xf32> to vector<8x32xf32>
    %cst_43 = arith.constant dense<0.000000e+00> : vector<8x32xf32>
    %51 = tpu.matmul %40, %37, %cst_43 {dimension_numbers = #tpu.dot_dimension_numbers<[1], [0], [0], [1], [0, 0, 1, 1], [], []>} : vector<8x32xbf16>, vector<32x32xbf16>, vector<8x32xf32> -> vector<8x32xf32>
    %52 = arith.addf %50, %51 : vector<8x32xf32>
    %53 = arith.negf %43 : vector<8x32xf32>
    %54 = math.exp %53 : vector<8x32xf32>
    %cst_44 = arith.constant 1.000000e+00 : f32
    %55 = vector.broadcast %cst_44 : f32 to vector<8x32xf32>
    %56 = arith.addf %55, %54 : vector<8x32xf32>
    %57 = arith.divf %55, %56 : vector<8x32xf32>
    %58 = arith.negf %46 : vector<8x32xf32>
    %59 = math.exp %58 : vector<8x32xf32>
    %cst_45 = arith.constant 1.000000e+00 : f32
    %60 = vector.broadcast %cst_45 : f32 to vector<8x32xf32>
    %61 = arith.addf %60, %59 : vector<8x32xf32>
    %62 = arith.divf %60, %61 : vector<8x32xf32>
    %63 = math.tanh %49 : vector<8x32xf32>
    %64 = arith.negf %52 : vector<8x32xf32>
    %65 = math.exp %64 : vector<8x32xf32>
    %cst_46 = arith.constant 1.000000e+00 : f32
    %66 = vector.broadcast %cst_46 : f32 to vector<8x32xf32>
    %67 = arith.addf %66, %65 : vector<8x32xf32>
    %68 = arith.divf %66, %67 : vector<8x32xf32>
    %69 = arith.mulf %62, %39 : vector<8x32xf32>
    %70 = arith.mulf %57, %63 : vector<8x32xf32>
    %71 = arith.addf %69, %70 : vector<8x32xf32>
    %72 = math.tanh %71 : vector<8x32xf32>
    %73 = arith.mulf %68, %72 : vector<8x32xf32>
    %74 = arith.truncf %73 : vector<8x32xf32> to vector<8x32xbf16>
    %75 = vector.extract_strided_slice %8 {offsets = [8, 0], sizes = [8, 32], strides = [1, 1]} : vector<64x32xf32> to vector<8x32xf32>
    %cst_47 = arith.constant dense<0.000000e+00> : vector<8x32xf32>
    %76 = tpu.matmul %74, %31, %cst_47 {dimension_numbers = #tpu.dot_dimension_numbers<[1], [0], [0], [1], [0, 0, 1, 1], [], []>} : vector<8x32xbf16>, vector<32x32xbf16>, vector<8x32xf32> -> vector<8x32xf32>
    %77 = arith.addf %75, %76 : vector<8x32xf32>
    %78 = vector.extract_strided_slice %15 {offsets = [8, 0], sizes = [8, 32], strides = [1, 1]} : vector<64x32xf32> to vector<8x32xf32>
    %cst_48 = arith.constant dense<0.000000e+00> : vector<8x32xf32>
    %79 = tpu.matmul %74, %33, %cst_48 {dimension_numbers = #tpu.dot_dimension_numbers<[1], [0], [0], [1], [0, 0, 1, 1], [], []>} : vector<8x32xbf16>, vector<32x32xbf16>, vector<8x32xf32> -> vector<8x32xf32>
    %80 = arith.addf %78, %79 : vector<8x32xf32>
    %81 = vector.extract_strided_slice %22 {offsets = [8, 0], sizes = [8, 32], strides = [1, 1]} : vector<64x32xf32> to vector<8x32xf32>
    %cst_49 = arith.constant dense<0.000000e+00> : vector<8x32xf32>
    %82 = tpu.matmul %74, %35, %cst_49 {dimension_numbers = #tpu.dot_dimension_numbers<[1], [0], [0], [1], [0, 0, 1, 1], [], []>} : vector<8x32xbf16>, vector<32x32xbf16>, vector<8x32xf32> -> vector<8x32xf32>
    %83 = arith.addf %81, %82 : vector<8x32xf32>
    %84 = vector.extract_strided_slice %29 {offsets = [8, 0], sizes = [8, 32], strides = [1, 1]} : vector<64x32xf32> to vector<8x32xf32>
    %cst_50 = arith.constant dense<0.000000e+00> : vector<8x32xf32>
    %85 = tpu.matmul %74, %37, %cst_50 {dimension_numbers = #tpu.dot_dimension_numbers<[1], [0], [0], [1], [0, 0, 1, 1], [], []>} : vector<8x32xbf16>, vector<32x32xbf16>, vector<8x32xf32> -> vector<8x32xf32>
    %86 = arith.addf %84, %85 : vector<8x32xf32>
    %87 = arith.negf %77 : vector<8x32xf32>
    %88 = math.exp %87 : vector<8x32xf32>
    %cst_51 = arith.constant 1.000000e+00 : f32
    %89 = vector.broadcast %cst_51 : f32 to vector<8x32xf32>
    %90 = arith.addf %89, %88 : vector<8x32xf32>
    %91 = arith.divf %89, %90 : vector<8x32xf32>
    %92 = arith.negf %80 : vector<8x32xf32>
    %93 = math.exp %92 : vector<8x32xf32>
    %cst_52 = arith.constant 1.000000e+00 : f32
    %94 = vector.broadcast %cst_52 : f32 to vector<8x32xf32>
    %95 = arith.addf %94, %93 : vector<8x32xf32>
    %96 = arith.divf %94, %95 : vector<8x32xf32>
    %97 = math.tanh %83 : vector<8x32xf32>
    %98 = arith.negf %86 : vector<8x32xf32>
    %99 = math.exp %98 : vector<8x32xf32>
    %cst_53 = arith.constant 1.000000e+00 : f32
    %100 = vector.broadcast %cst_53 : f32 to vector<8x32xf32>
    %101 = arith.addf %100, %99 : vector<8x32xf32>
    %102 = arith.divf %100, %101 : vector<8x32xf32>
    %103 = arith.mulf %96, %71 : vector<8x32xf32>
    %104 = arith.mulf %91, %97 : vector<8x32xf32>
    %105 = arith.addf %103, %104 : vector<8x32xf32>
    %106 = math.tanh %105 : vector<8x32xf32>
    %107 = arith.mulf %102, %106 : vector<8x32xf32>
    %108 = arith.truncf %107 : vector<8x32xf32> to vector<8x32xbf16>
    %109 = vector.extract_strided_slice %8 {offsets = [16, 0], sizes = [8, 32], strides = [1, 1]} : vector<64x32xf32> to vector<8x32xf32>
    %cst_54 = arith.constant dense<0.000000e+00> : vector<8x32xf32>
    %110 = tpu.matmul %108, %31, %cst_54 {dimension_numbers = #tpu.dot_dimension_numbers<[1], [0], [0], [1], [0, 0, 1, 1], [], []>} : vector<8x32xbf16>, vector<32x32xbf16>, vector<8x32xf32> -> vector<8x32xf32>
    %111 = arith.addf %109, %110 : vector<8x32xf32>
    %112 = vector.extract_strided_slice %15 {offsets = [16, 0], sizes = [8, 32], strides = [1, 1]} : vector<64x32xf32> to vector<8x32xf32>
    %cst_55 = arith.constant dense<0.000000e+00> : vector<8x32xf32>
    %113 = tpu.matmul %108, %33, %cst_55 {dimension_numbers = #tpu.dot_dimension_numbers<[1], [0], [0], [1], [0, 0, 1, 1], [], []>} : vector<8x32xbf16>, vector<32x32xbf16>, vector<8x32xf32> -> vector<8x32xf32>
    %114 = arith.addf %112, %113 : vector<8x32xf32>
    %115 = vector.extract_strided_slice %22 {offsets = [16, 0], sizes = [8, 32], strides = [1, 1]} : vector<64x32xf32> to vector<8x32xf32>
    %cst_56 = arith.constant dense<0.000000e+00> : vector<8x32xf32>
    %116 = tpu.matmul %108, %35, %cst_56 {dimension_numbers = #tpu.dot_dimension_numbers<[1], [0], [0], [1], [0, 0, 1, 1], [], []>} : vector<8x32xbf16>, vector<32x32xbf16>, vector<8x32xf32> -> vector<8x32xf32>
    %117 = arith.addf %115, %116 : vector<8x32xf32>
    %118 = vector.extract_strided_slice %29 {offsets = [16, 0], sizes = [8, 32], strides = [1, 1]} : vector<64x32xf32> to vector<8x32xf32>
    %cst_57 = arith.constant dense<0.000000e+00> : vector<8x32xf32>
    %119 = tpu.matmul %108, %37, %cst_57 {dimension_numbers = #tpu.dot_dimension_numbers<[1], [0], [0], [1], [0, 0, 1, 1], [], []>} : vector<8x32xbf16>, vector<32x32xbf16>, vector<8x32xf32> -> vector<8x32xf32>
    %120 = arith.addf %118, %119 : vector<8x32xf32>
    %121 = arith.negf %111 : vector<8x32xf32>
    %122 = math.exp %121 : vector<8x32xf32>
    %cst_58 = arith.constant 1.000000e+00 : f32
    %123 = vector.broadcast %cst_58 : f32 to vector<8x32xf32>
    %124 = arith.addf %123, %122 : vector<8x32xf32>
    %125 = arith.divf %123, %124 : vector<8x32xf32>
    %126 = arith.negf %114 : vector<8x32xf32>
    %127 = math.exp %126 : vector<8x32xf32>
    %cst_59 = arith.constant 1.000000e+00 : f32
    %128 = vector.broadcast %cst_59 : f32 to vector<8x32xf32>
    %129 = arith.addf %128, %127 : vector<8x32xf32>
    %130 = arith.divf %128, %129 : vector<8x32xf32>
    %131 = math.tanh %117 : vector<8x32xf32>
    %132 = arith.negf %120 : vector<8x32xf32>
    %133 = math.exp %132 : vector<8x32xf32>
    %cst_60 = arith.constant 1.000000e+00 : f32
    %134 = vector.broadcast %cst_60 : f32 to vector<8x32xf32>
    %135 = arith.addf %134, %133 : vector<8x32xf32>
    %136 = arith.divf %134, %135 : vector<8x32xf32>
    %137 = arith.mulf %130, %105 : vector<8x32xf32>
    %138 = arith.mulf %125, %131 : vector<8x32xf32>
    %139 = arith.addf %137, %138 : vector<8x32xf32>
    %140 = math.tanh %139 : vector<8x32xf32>
    %141 = arith.mulf %136, %140 : vector<8x32xf32>
    %142 = arith.truncf %141 : vector<8x32xf32> to vector<8x32xbf16>
    %143 = vector.extract_strided_slice %8 {offsets = [24, 0], sizes = [8, 32], strides = [1, 1]} : vector<64x32xf32> to vector<8x32xf32>
    %cst_61 = arith.constant dense<0.000000e+00> : vector<8x32xf32>
    %144 = tpu.matmul %142, %31, %cst_61 {dimension_numbers = #tpu.dot_dimension_numbers<[1], [0], [0], [1], [0, 0, 1, 1], [], []>} : vector<8x32xbf16>, vector<32x32xbf16>, vector<8x32xf32> -> vector<8x32xf32>
    %145 = arith.addf %143, %144 : vector<8x32xf32>
    %146 = vector.extract_strided_slice %15 {offsets = [24, 0], sizes = [8, 32], strides = [1, 1]} : vector<64x32xf32> to vector<8x32xf32>
    %cst_62 = arith.constant dense<0.000000e+00> : vector<8x32xf32>
    %147 = tpu.matmul %142, %33, %cst_62 {dimension_numbers = #tpu.dot_dimension_numbers<[1], [0], [0], [1], [0, 0, 1, 1], [], []>} : vector<8x32xbf16>, vector<32x32xbf16>, vector<8x32xf32> -> vector<8x32xf32>
    %148 = arith.addf %146, %147 : vector<8x32xf32>
    %149 = vector.extract_strided_slice %22 {offsets = [24, 0], sizes = [8, 32], strides = [1, 1]} : vector<64x32xf32> to vector<8x32xf32>
    %cst_63 = arith.constant dense<0.000000e+00> : vector<8x32xf32>
    %150 = tpu.matmul %142, %35, %cst_63 {dimension_numbers = #tpu.dot_dimension_numbers<[1], [0], [0], [1], [0, 0, 1, 1], [], []>} : vector<8x32xbf16>, vector<32x32xbf16>, vector<8x32xf32> -> vector<8x32xf32>
    %151 = arith.addf %149, %150 : vector<8x32xf32>
    %152 = vector.extract_strided_slice %29 {offsets = [24, 0], sizes = [8, 32], strides = [1, 1]} : vector<64x32xf32> to vector<8x32xf32>
    %cst_64 = arith.constant dense<0.000000e+00> : vector<8x32xf32>
    %153 = tpu.matmul %142, %37, %cst_64 {dimension_numbers = #tpu.dot_dimension_numbers<[1], [0], [0], [1], [0, 0, 1, 1], [], []>} : vector<8x32xbf16>, vector<32x32xbf16>, vector<8x32xf32> -> vector<8x32xf32>
    %154 = arith.addf %152, %153 : vector<8x32xf32>
    %155 = arith.negf %145 : vector<8x32xf32>
    %156 = math.exp %155 : vector<8x32xf32>
    %cst_65 = arith.constant 1.000000e+00 : f32
    %157 = vector.broadcast %cst_65 : f32 to vector<8x32xf32>
    %158 = arith.addf %157, %156 : vector<8x32xf32>
    %159 = arith.divf %157, %158 : vector<8x32xf32>
    %160 = arith.negf %148 : vector<8x32xf32>
    %161 = math.exp %160 : vector<8x32xf32>
    %cst_66 = arith.constant 1.000000e+00 : f32
    %162 = vector.broadcast %cst_66 : f32 to vector<8x32xf32>
    %163 = arith.addf %162, %161 : vector<8x32xf32>
    %164 = arith.divf %162, %163 : vector<8x32xf32>
    %165 = math.tanh %151 : vector<8x32xf32>
    %166 = arith.negf %154 : vector<8x32xf32>
    %167 = math.exp %166 : vector<8x32xf32>
    %cst_67 = arith.constant 1.000000e+00 : f32
    %168 = vector.broadcast %cst_67 : f32 to vector<8x32xf32>
    %169 = arith.addf %168, %167 : vector<8x32xf32>
    %170 = arith.divf %168, %169 : vector<8x32xf32>
    %171 = arith.mulf %164, %139 : vector<8x32xf32>
    %172 = arith.mulf %159, %165 : vector<8x32xf32>
    %173 = arith.addf %171, %172 : vector<8x32xf32>
    %174 = math.tanh %173 : vector<8x32xf32>
    %175 = arith.mulf %170, %174 : vector<8x32xf32>
    %176 = arith.truncf %175 : vector<8x32xf32> to vector<8x32xbf16>
    %177 = vector.extract_strided_slice %8 {offsets = [32, 0], sizes = [8, 32], strides = [1, 1]} : vector<64x32xf32> to vector<8x32xf32>
    %cst_68 = arith.constant dense<0.000000e+00> : vector<8x32xf32>
    %178 = tpu.matmul %176, %31, %cst_68 {dimension_numbers = #tpu.dot_dimension_numbers<[1], [0], [0], [1], [0, 0, 1, 1], [], []>} : vector<8x32xbf16>, vector<32x32xbf16>, vector<8x32xf32> -> vector<8x32xf32>
    %179 = arith.addf %177, %178 : vector<8x32xf32>
    %180 = vector.extract_strided_slice %15 {offsets = [32, 0], sizes = [8, 32], strides = [1, 1]} : vector<64x32xf32> to vector<8x32xf32>
    %cst_69 = arith.constant dense<0.000000e+00> : vector<8x32xf32>
    %181 = tpu.matmul %176, %33, %cst_69 {dimension_numbers = #tpu.dot_dimension_numbers<[1], [0], [0], [1], [0, 0, 1, 1], [], []>} : vector<8x32xbf16>, vector<32x32xbf16>, vector<8x32xf32> -> vector<8x32xf32>
    %182 = arith.addf %180, %181 : vector<8x32xf32>
    %183 = vector.extract_strided_slice %22 {offsets = [32, 0], sizes = [8, 32], strides = [1, 1]} : vector<64x32xf32> to vector<8x32xf32>
    %cst_70 = arith.constant dense<0.000000e+00> : vector<8x32xf32>
    %184 = tpu.matmul %176, %35, %cst_70 {dimension_numbers = #tpu.dot_dimension_numbers<[1], [0], [0], [1], [0, 0, 1, 1], [], []>} : vector<8x32xbf16>, vector<32x32xbf16>, vector<8x32xf32> -> vector<8x32xf32>
    %185 = arith.addf %183, %184 : vector<8x32xf32>
    %186 = vector.extract_strided_slice %29 {offsets = [32, 0], sizes = [8, 32], strides = [1, 1]} : vector<64x32xf32> to vector<8x32xf32>
    %cst_71 = arith.constant dense<0.000000e+00> : vector<8x32xf32>
    %187 = tpu.matmul %176, %37, %cst_71 {dimension_numbers = #tpu.dot_dimension_numbers<[1], [0], [0], [1], [0, 0, 1, 1], [], []>} : vector<8x32xbf16>, vector<32x32xbf16>, vector<8x32xf32> -> vector<8x32xf32>
    %188 = arith.addf %186, %187 : vector<8x32xf32>
    %189 = arith.negf %179 : vector<8x32xf32>
    %190 = math.exp %189 : vector<8x32xf32>
    %cst_72 = arith.constant 1.000000e+00 : f32
    %191 = vector.broadcast %cst_72 : f32 to vector<8x32xf32>
    %192 = arith.addf %191, %190 : vector<8x32xf32>
    %193 = arith.divf %191, %192 : vector<8x32xf32>
    %194 = arith.negf %182 : vector<8x32xf32>
    %195 = math.exp %194 : vector<8x32xf32>
    %cst_73 = arith.constant 1.000000e+00 : f32
    %196 = vector.broadcast %cst_73 : f32 to vector<8x32xf32>
    %197 = arith.addf %196, %195 : vector<8x32xf32>
    %198 = arith.divf %196, %197 : vector<8x32xf32>
    %199 = math.tanh %185 : vector<8x32xf32>
    %200 = arith.negf %188 : vector<8x32xf32>
    %201 = math.exp %200 : vector<8x32xf32>
    %cst_74 = arith.constant 1.000000e+00 : f32
    %202 = vector.broadcast %cst_74 : f32 to vector<8x32xf32>
    %203 = arith.addf %202, %201 : vector<8x32xf32>
    %204 = arith.divf %202, %203 : vector<8x32xf32>
    %205 = arith.mulf %198, %173 : vector<8x32xf32>
    %206 = arith.mulf %193, %199 : vector<8x32xf32>
    %207 = arith.addf %205, %206 : vector<8x32xf32>
    %208 = math.tanh %207 : vector<8x32xf32>
    %209 = arith.mulf %204, %208 : vector<8x32xf32>
    %210 = arith.truncf %209 : vector<8x32xf32> to vector<8x32xbf16>
    %211 = vector.extract_strided_slice %8 {offsets = [40, 0], sizes = [8, 32], strides = [1, 1]} : vector<64x32xf32> to vector<8x32xf32>
    %cst_75 = arith.constant dense<0.000000e+00> : vector<8x32xf32>
    %212 = tpu.matmul %210, %31, %cst_75 {dimension_numbers = #tpu.dot_dimension_numbers<[1], [0], [0], [1], [0, 0, 1, 1], [], []>} : vector<8x32xbf16>, vector<32x32xbf16>, vector<8x32xf32> -> vector<8x32xf32>
    %213 = arith.addf %211, %212 : vector<8x32xf32>
    %214 = vector.extract_strided_slice %15 {offsets = [40, 0], sizes = [8, 32], strides = [1, 1]} : vector<64x32xf32> to vector<8x32xf32>
    %cst_76 = arith.constant dense<0.000000e+00> : vector<8x32xf32>
    %215 = tpu.matmul %210, %33, %cst_76 {dimension_numbers = #tpu.dot_dimension_numbers<[1], [0], [0], [1], [0, 0, 1, 1], [], []>} : vector<8x32xbf16>, vector<32x32xbf16>, vector<8x32xf32> -> vector<8x32xf32>
    %216 = arith.addf %214, %215 : vector<8x32xf32>
    %217 = vector.extract_strided_slice %22 {offsets = [40, 0], sizes = [8, 32], strides = [1, 1]} : vector<64x32xf32> to vector<8x32xf32>
    %cst_77 = arith.constant dense<0.000000e+00> : vector<8x32xf32>
    %218 = tpu.matmul %210, %35, %cst_77 {dimension_numbers = #tpu.dot_dimension_numbers<[1], [0], [0], [1], [0, 0, 1, 1], [], []>} : vector<8x32xbf16>, vector<32x32xbf16>, vector<8x32xf32> -> vector<8x32xf32>
    %219 = arith.addf %217, %218 : vector<8x32xf32>
    %220 = vector.extract_strided_slice %29 {offsets = [40, 0], sizes = [8, 32], strides = [1, 1]} : vector<64x32xf32> to vector<8x32xf32>
    %cst_78 = arith.constant dense<0.000000e+00> : vector<8x32xf32>
    %221 = tpu.matmul %210, %37, %cst_78 {dimension_numbers = #tpu.dot_dimension_numbers<[1], [0], [0], [1], [0, 0, 1, 1], [], []>} : vector<8x32xbf16>, vector<32x32xbf16>, vector<8x32xf32> -> vector<8x32xf32>
    %222 = arith.addf %220, %221 : vector<8x32xf32>
    %223 = arith.negf %213 : vector<8x32xf32>
    %224 = math.exp %223 : vector<8x32xf32>
    %cst_79 = arith.constant 1.000000e+00 : f32
    %225 = vector.broadcast %cst_79 : f32 to vector<8x32xf32>
    %226 = arith.addf %225, %224 : vector<8x32xf32>
    %227 = arith.divf %225, %226 : vector<8x32xf32>
    %228 = arith.negf %216 : vector<8x32xf32>
    %229 = math.exp %228 : vector<8x32xf32>
    %cst_80 = arith.constant 1.000000e+00 : f32
    %230 = vector.broadcast %cst_80 : f32 to vector<8x32xf32>
    %231 = arith.addf %230, %229 : vector<8x32xf32>
    %232 = arith.divf %230, %231 : vector<8x32xf32>
    %233 = math.tanh %219 : vector<8x32xf32>
    %234 = arith.negf %222 : vector<8x32xf32>
    %235 = math.exp %234 : vector<8x32xf32>
    %cst_81 = arith.constant 1.000000e+00 : f32
    %236 = vector.broadcast %cst_81 : f32 to vector<8x32xf32>
    %237 = arith.addf %236, %235 : vector<8x32xf32>
    %238 = arith.divf %236, %237 : vector<8x32xf32>
    %239 = arith.mulf %232, %207 : vector<8x32xf32>
    %240 = arith.mulf %227, %233 : vector<8x32xf32>
    %241 = arith.addf %239, %240 : vector<8x32xf32>
    %242 = math.tanh %241 : vector<8x32xf32>
    %243 = arith.mulf %238, %242 : vector<8x32xf32>
    %244 = arith.truncf %243 : vector<8x32xf32> to vector<8x32xbf16>
    %245 = vector.extract_strided_slice %8 {offsets = [48, 0], sizes = [8, 32], strides = [1, 1]} : vector<64x32xf32> to vector<8x32xf32>
    %cst_82 = arith.constant dense<0.000000e+00> : vector<8x32xf32>
    %246 = tpu.matmul %244, %31, %cst_82 {dimension_numbers = #tpu.dot_dimension_numbers<[1], [0], [0], [1], [0, 0, 1, 1], [], []>} : vector<8x32xbf16>, vector<32x32xbf16>, vector<8x32xf32> -> vector<8x32xf32>
    %247 = arith.addf %245, %246 : vector<8x32xf32>
    %248 = vector.extract_strided_slice %15 {offsets = [48, 0], sizes = [8, 32], strides = [1, 1]} : vector<64x32xf32> to vector<8x32xf32>
    %cst_83 = arith.constant dense<0.000000e+00> : vector<8x32xf32>
    %249 = tpu.matmul %244, %33, %cst_83 {dimension_numbers = #tpu.dot_dimension_numbers<[1], [0], [0], [1], [0, 0, 1, 1], [], []>} : vector<8x32xbf16>, vector<32x32xbf16>, vector<8x32xf32> -> vector<8x32xf32>
    %250 = arith.addf %248, %249 : vector<8x32xf32>
    %251 = vector.extract_strided_slice %22 {offsets = [48, 0], sizes = [8, 32], strides = [1, 1]} : vector<64x32xf32> to vector<8x32xf32>
    %cst_84 = arith.constant dense<0.000000e+00> : vector<8x32xf32>
    %252 = tpu.matmul %244, %35, %cst_84 {dimension_numbers = #tpu.dot_dimension_numbers<[1], [0], [0], [1], [0, 0, 1, 1], [], []>} : vector<8x32xbf16>, vector<32x32xbf16>, vector<8x32xf32> -> vector<8x32xf32>
    %253 = arith.addf %251, %252 : vector<8x32xf32>
    %254 = vector.extract_strided_slice %29 {offsets = [48, 0], sizes = [8, 32], strides = [1, 1]} : vector<64x32xf32> to vector<8x32xf32>
    %cst_85 = arith.constant dense<0.000000e+00> : vector<8x32xf32>
    %255 = tpu.matmul %244, %37, %cst_85 {dimension_numbers = #tpu.dot_dimension_numbers<[1], [0], [0], [1], [0, 0, 1, 1], [], []>} : vector<8x32xbf16>, vector<32x32xbf16>, vector<8x32xf32> -> vector<8x32xf32>
    %256 = arith.addf %254, %255 : vector<8x32xf32>
    %257 = arith.negf %247 : vector<8x32xf32>
    %258 = math.exp %257 : vector<8x32xf32>
    %cst_86 = arith.constant 1.000000e+00 : f32
    %259 = vector.broadcast %cst_86 : f32 to vector<8x32xf32>
    %260 = arith.addf %259, %258 : vector<8x32xf32>
    %261 = arith.divf %259, %260 : vector<8x32xf32>
    %262 = arith.negf %250 : vector<8x32xf32>
    %263 = math.exp %262 : vector<8x32xf32>
    %cst_87 = arith.constant 1.000000e+00 : f32
    %264 = vector.broadcast %cst_87 : f32 to vector<8x32xf32>
    %265 = arith.addf %264, %263 : vector<8x32xf32>
    %266 = arith.divf %264, %265 : vector<8x32xf32>
    %267 = math.tanh %253 : vector<8x32xf32>
    %268 = arith.negf %256 : vector<8x32xf32>
    %269 = math.exp %268 : vector<8x32xf32>
    %cst_88 = arith.constant 1.000000e+00 : f32
    %270 = vector.broadcast %cst_88 : f32 to vector<8x32xf32>
    %271 = arith.addf %270, %269 : vector<8x32xf32>
    %272 = arith.divf %270, %271 : vector<8x32xf32>
    %273 = arith.mulf %266, %241 : vector<8x32xf32>
    %274 = arith.mulf %261, %267 : vector<8x32xf32>
    %275 = arith.addf %273, %274 : vector<8x32xf32>
    %276 = math.tanh %275 : vector<8x32xf32>
    %277 = arith.mulf %272, %276 : vector<8x32xf32>
    %278 = arith.truncf %277 : vector<8x32xf32> to vector<8x32xbf16>
    %279 = vector.extract_strided_slice %8 {offsets = [56, 0], sizes = [8, 32], strides = [1, 1]} : vector<64x32xf32> to vector<8x32xf32>
    %cst_89 = arith.constant dense<0.000000e+00> : vector<8x32xf32>
    %280 = tpu.matmul %278, %31, %cst_89 {dimension_numbers = #tpu.dot_dimension_numbers<[1], [0], [0], [1], [0, 0, 1, 1], [], []>} : vector<8x32xbf16>, vector<32x32xbf16>, vector<8x32xf32> -> vector<8x32xf32>
    %281 = arith.addf %279, %280 : vector<8x32xf32>
    %282 = vector.extract_strided_slice %15 {offsets = [56, 0], sizes = [8, 32], strides = [1, 1]} : vector<64x32xf32> to vector<8x32xf32>
    %cst_90 = arith.constant dense<0.000000e+00> : vector<8x32xf32>
    %283 = tpu.matmul %278, %33, %cst_90 {dimension_numbers = #tpu.dot_dimension_numbers<[1], [0], [0], [1], [0, 0, 1, 1], [], []>} : vector<8x32xbf16>, vector<32x32xbf16>, vector<8x32xf32> -> vector<8x32xf32>
    %284 = arith.addf %282, %283 : vector<8x32xf32>
    %285 = vector.extract_strided_slice %22 {offsets = [56, 0], sizes = [8, 32], strides = [1, 1]} : vector<64x32xf32> to vector<8x32xf32>
    %cst_91 = arith.constant dense<0.000000e+00> : vector<8x32xf32>
    %286 = tpu.matmul %278, %35, %cst_91 {dimension_numbers = #tpu.dot_dimension_numbers<[1], [0], [0], [1], [0, 0, 1, 1], [], []>} : vector<8x32xbf16>, vector<32x32xbf16>, vector<8x32xf32> -> vector<8x32xf32>
    %287 = arith.addf %285, %286 : vector<8x32xf32>
    %288 = vector.extract_strided_slice %29 {offsets = [56, 0], sizes = [8, 32], strides = [1, 1]} : vector<64x32xf32> to vector<8x32xf32>
    %cst_92 = arith.constant dense<0.000000e+00> : vector<8x32xf32>
    %289 = tpu.matmul %278, %37, %cst_92 {dimension_numbers = #tpu.dot_dimension_numbers<[1], [0], [0], [1], [0, 0, 1, 1], [], []>} : vector<8x32xbf16>, vector<32x32xbf16>, vector<8x32xf32> -> vector<8x32xf32>
    %290 = arith.addf %288, %289 : vector<8x32xf32>
    %291 = arith.negf %281 : vector<8x32xf32>
    %292 = math.exp %291 : vector<8x32xf32>
    %cst_93 = arith.constant 1.000000e+00 : f32
    %293 = vector.broadcast %cst_93 : f32 to vector<8x32xf32>
    %294 = arith.addf %293, %292 : vector<8x32xf32>
    %295 = arith.divf %293, %294 : vector<8x32xf32>
    %296 = arith.negf %284 : vector<8x32xf32>
    %297 = math.exp %296 : vector<8x32xf32>
    %cst_94 = arith.constant 1.000000e+00 : f32
    %298 = vector.broadcast %cst_94 : f32 to vector<8x32xf32>
    %299 = arith.addf %298, %297 : vector<8x32xf32>
    %300 = arith.divf %298, %299 : vector<8x32xf32>
    %301 = math.tanh %287 : vector<8x32xf32>
    %302 = arith.negf %290 : vector<8x32xf32>
    %303 = math.exp %302 : vector<8x32xf32>
    %cst_95 = arith.constant 1.000000e+00 : f32
    %304 = vector.broadcast %cst_95 : f32 to vector<8x32xf32>
    %305 = arith.addf %304, %303 : vector<8x32xf32>
    %306 = arith.divf %304, %305 : vector<8x32xf32>
    %307 = arith.mulf %300, %275 : vector<8x32xf32>
    %308 = arith.mulf %295, %301 : vector<8x32xf32>
    %309 = arith.addf %307, %308 : vector<8x32xf32>
    %310 = math.tanh %309 : vector<8x32xf32>
    %311 = arith.mulf %306, %310 : vector<8x32xf32>
    %312 = vector.extract_strided_slice %1 {offsets = [56, 0], sizes = [8, 32], strides = [1, 1]} : vector<64x32xbf16> to vector<8x32xbf16>
    %c0_96 = arith.constant 0 : index
    %c0_97 = arith.constant 0 : index
    %c0_98 = arith.constant 0 : index
    %313 = vector.load %arg5[%c0_96, %c0_97, %c0_98] : memref<4x32x32xbf16, #tpu.memory_space<vmem>>, vector<1x32x32xbf16>
    %314 = vector.shape_cast %313 : vector<1x32x32xbf16> to vector<32x32xbf16>
    %cst_99 = arith.constant dense<0.000000e+00> : vector<8x32xf32>
    %315 = tpu.matmul %312, %314, %cst_99 {dimension_numbers = #tpu.dot_dimension_numbers<[1], [0], [0], [1], [0, 0, 1, 1], [], []>} : vector<8x32xbf16>, vector<32x32xbf16>, vector<8x32xf32> -> vector<8x32xf32>
    %c0_100 = arith.constant 0 : index
    %c0_101 = arith.constant 0 : index
    %c0_102 = arith.constant 0 : index
    %316 = vector.load %arg6[%c0_100, %c0_101, %c0_102] : memref<4x1x32xf32, #tpu.memory_space<vmem>>, vector<1x1x32xf32>
    %317 = vector.shape_cast %316 : vector<1x1x32xf32> to vector<1x32xf32>
    %318 = vector.broadcast %317 : vector<1x32xf32> to vector<8x32xf32>
    %319 = arith.addf %315, %318 : vector<8x32xf32>
    %c1_103 = arith.constant 1 : index
    %c0_104 = arith.constant 0 : index
    %c0_105 = arith.constant 0 : index
    %320 = vector.load %arg5[%c1_103, %c0_104, %c0_105] : memref<4x32x32xbf16, #tpu.memory_space<vmem>>, vector<1x32x32xbf16>
    %321 = vector.shape_cast %320 : vector<1x32x32xbf16> to vector<32x32xbf16>
    %cst_106 = arith.constant dense<0.000000e+00> : vector<8x32xf32>
    %322 = tpu.matmul %312, %321, %cst_106 {dimension_numbers = #tpu.dot_dimension_numbers<[1], [0], [0], [1], [0, 0, 1, 1], [], []>} : vector<8x32xbf16>, vector<32x32xbf16>, vector<8x32xf32> -> vector<8x32xf32>
    %c1_107 = arith.constant 1 : index
    %c0_108 = arith.constant 0 : index
    %c0_109 = arith.constant 0 : index
    %323 = vector.load %arg6[%c1_107, %c0_108, %c0_109] : memref<4x1x32xf32, #tpu.memory_space<vmem>>, vector<1x1x32xf32>
    %324 = vector.shape_cast %323 : vector<1x1x32xf32> to vector<1x32xf32>
    %325 = vector.broadcast %324 : vector<1x32xf32> to vector<8x32xf32>
    %326 = arith.addf %322, %325 : vector<8x32xf32>
    %c2_110 = arith.constant 2 : index
    %c0_111 = arith.constant 0 : index
    %c0_112 = arith.constant 0 : index
    %327 = vector.load %arg5[%c2_110, %c0_111, %c0_112] : memref<4x32x32xbf16, #tpu.memory_space<vmem>>, vector<1x32x32xbf16>
    %328 = vector.shape_cast %327 : vector<1x32x32xbf16> to vector<32x32xbf16>
    %cst_113 = arith.constant dense<0.000000e+00> : vector<8x32xf32>
    %329 = tpu.matmul %312, %328, %cst_113 {dimension_numbers = #tpu.dot_dimension_numbers<[1], [0], [0], [1], [0, 0, 1, 1], [], []>} : vector<8x32xbf16>, vector<32x32xbf16>, vector<8x32xf32> -> vector<8x32xf32>
    %c2_114 = arith.constant 2 : index
    %c0_115 = arith.constant 0 : index
    %c0_116 = arith.constant 0 : index
    %330 = vector.load %arg6[%c2_114, %c0_115, %c0_116] : memref<4x1x32xf32, #tpu.memory_space<vmem>>, vector<1x1x32xf32>
    %331 = vector.shape_cast %330 : vector<1x1x32xf32> to vector<1x32xf32>
    %332 = vector.broadcast %331 : vector<1x32xf32> to vector<8x32xf32>
    %333 = arith.addf %329, %332 : vector<8x32xf32>
    %c3_117 = arith.constant 3 : index
    %c0_118 = arith.constant 0 : index
    %c0_119 = arith.constant 0 : index
    %334 = vector.load %arg5[%c3_117, %c0_118, %c0_119] : memref<4x32x32xbf16, #tpu.memory_space<vmem>>, vector<1x32x32xbf16>
    %335 = vector.shape_cast %334 : vector<1x32x32xbf16> to vector<32x32xbf16>
    %cst_120 = arith.constant dense<0.000000e+00> : vector<8x32xf32>
    %336 = tpu.matmul %312, %335, %cst_120 {dimension_numbers = #tpu.dot_dimension_numbers<[1], [0], [0], [1], [0, 0, 1, 1], [], []>} : vector<8x32xbf16>, vector<32x32xbf16>, vector<8x32xf32> -> vector<8x32xf32>
    %c3_121 = arith.constant 3 : index
    %c0_122 = arith.constant 0 : index
    %c0_123 = arith.constant 0 : index
    %337 = vector.load %arg6[%c3_121, %c0_122, %c0_123] : memref<4x1x32xf32, #tpu.memory_space<vmem>>, vector<1x1x32xf32>
    %338 = vector.shape_cast %337 : vector<1x1x32xf32> to vector<1x32xf32>
    %339 = vector.broadcast %338 : vector<1x32xf32> to vector<8x32xf32>
    %340 = arith.addf %336, %339 : vector<8x32xf32>
    %cst_124 = arith.constant 0.000000e+00 : f32
    %341 = vector.broadcast %cst_124 : f32 to vector<8x32xf32>
    %342 = arith.negf %319 : vector<8x32xf32>
    %343 = math.exp %342 : vector<8x32xf32>
    %cst_125 = arith.constant 1.000000e+00 : f32
    %344 = vector.broadcast %cst_125 : f32 to vector<8x32xf32>
    %345 = arith.addf %344, %343 : vector<8x32xf32>
    %346 = arith.divf %344, %345 : vector<8x32xf32>
    %347 = arith.negf %326 : vector<8x32xf32>
    %348 = math.exp %347 : vector<8x32xf32>
    %cst_126 = arith.constant 1.000000e+00 : f32
    %349 = vector.broadcast %cst_126 : f32 to vector<8x32xf32>
    %350 = arith.addf %349, %348 : vector<8x32xf32>
    %351 = arith.divf %349, %350 : vector<8x32xf32>
    %352 = math.tanh %333 : vector<8x32xf32>
    %353 = arith.negf %340 : vector<8x32xf32>
    %354 = math.exp %353 : vector<8x32xf32>
    %cst_127 = arith.constant 1.000000e+00 : f32
    %355 = vector.broadcast %cst_127 : f32 to vector<8x32xf32>
    %356 = arith.addf %355, %354 : vector<8x32xf32>
    %357 = arith.divf %355, %356 : vector<8x32xf32>
    %358 = arith.mulf %351, %341 : vector<8x32xf32>
    %359 = arith.mulf %346, %352 : vector<8x32xf32>
    %360 = arith.addf %358, %359 : vector<8x32xf32>
    %361 = math.tanh %360 : vector<8x32xf32>
    %362 = arith.mulf %357, %361 : vector<8x32xf32>
    %363 = arith.truncf %311 : vector<8x32xf32> to vector<8x32xbf16>
    %c0_128 = arith.constant 0 : index
    %c0_129 = arith.constant 0 : index
    %364 = vector.load %arg7[%c0_128, %c0_129] : memref<32x128xbf16, #tpu.memory_space<vmem>>, vector<32x128xbf16>
    %cst_130 = arith.constant dense<0.000000e+00> : vector<8x128xf32>
    %365 = tpu.matmul %363, %364, %cst_130 {dimension_numbers = #tpu.dot_dimension_numbers<[1], [0], [0], [1], [0, 0, 1, 1], [], []>} : vector<8x32xbf16>, vector<32x128xbf16>, vector<8x128xf32> -> vector<8x128xf32>
    %366 = arith.truncf %362 : vector<8x32xf32> to vector<8x32xbf16>
    %c0_131 = arith.constant 0 : index
    %c0_132 = arith.constant 0 : index
    %367 = vector.load %arg8[%c0_131, %c0_132] : memref<32x128xbf16, #tpu.memory_space<vmem>>, vector<32x128xbf16>
    %cst_133 = arith.constant dense<0.000000e+00> : vector<8x128xf32>
    %368 = tpu.matmul %366, %367, %cst_133 {dimension_numbers = #tpu.dot_dimension_numbers<[1], [0], [0], [1], [0, 0, 1, 1], [], []>} : vector<8x32xbf16>, vector<32x128xbf16>, vector<8x128xf32> -> vector<8x128xf32>
    %369 = arith.addf %365, %368 : vector<8x128xf32>
    %c0_134 = arith.constant 0 : index
    %c0_135 = arith.constant 0 : index
    %370 = vector.load %arg9[%c0_134, %c0_135] : memref<1x128xf32, #tpu.memory_space<vmem>>, vector<1x128xf32>
    %371 = vector.broadcast %370 : vector<1x128xf32> to vector<8x128xf32>
    %372 = arith.addf %369, %371 : vector<8x128xf32>
    %c0_136 = arith.constant 0 : index
    %c0_137 = arith.constant 0 : index
    %373 = vector.load %arg10[%c0_136, %c0_137] : memref<8x128xf32, #tpu.memory_space<vmem>>, vector<8x128xf32>
    tpu.vector_store %arg10[%c0_136, %c0_137], %372 {strides = array<i32>} : memref<8x128xf32, #tpu.memory_space<vmem>>, vector<8x128xf32>,
    return
  }
  func.func @transform_0(%arg0: i32) -> (i32, i32, i32) {
    %c0_i32 = arith.constant 0 : i32
    %c0_i32_0 = arith.constant 0 : i32
    %c0_i32_1 = arith.constant 0 : i32
    return %arg0, %c0_i32, %c0_i32_0 : i32, i32, i32
  }
  func.func @transform_1(%arg0: i32) -> (i32, i32, i32) {
    %c0_i32 = arith.constant 0 : i32
    %c0_i32_0 = arith.constant 0 : i32
    %c0_i32_1 = arith.constant 0 : i32
    %c0_i32_2 = arith.constant 0 : i32
    return %c0_i32, %c0_i32_0, %c0_i32_1 : i32, i32, i32
  }
  func.func @transform_2(%arg0: i32) -> (i32, i32, i32) {
    %c0_i32 = arith.constant 0 : i32
    %c0_i32_0 = arith.constant 0 : i32
    %c0_i32_1 = arith.constant 0 : i32
    %c0_i32_2 = arith.constant 0 : i32
    return %c0_i32, %c0_i32_0, %c0_i32_1 : i32, i32, i32
  }
  func.func @transform_3(%arg0: i32) -> (i32, i32, i32) {
    %c0_i32 = arith.constant 0 : i32
    %c0_i32_0 = arith.constant 0 : i32
    %c0_i32_1 = arith.constant 0 : i32
    %c0_i32_2 = arith.constant 0 : i32
    return %c0_i32, %c0_i32_0, %c0_i32_1 : i32, i32, i32
  }
  func.func @transform_4(%arg0: i32) -> (i32, i32, i32) {
    %c0_i32 = arith.constant 0 : i32
    %c0_i32_0 = arith.constant 0 : i32
    %c0_i32_1 = arith.constant 0 : i32
    %c0_i32_2 = arith.constant 0 : i32
    return %c0_i32, %c0_i32_0, %c0_i32_1 : i32, i32, i32
  }
  func.func @transform_5(%arg0: i32) -> (i32, i32, i32) {
    %c0_i32 = arith.constant 0 : i32
    %c0_i32_0 = arith.constant 0 : i32
    %c0_i32_1 = arith.constant 0 : i32
    %c0_i32_2 = arith.constant 0 : i32
    return %c0_i32, %c0_i32_0, %c0_i32_1 : i32, i32, i32
  }
  func.func @transform_6(%arg0: i32) -> (i32, i32) {
    %c0_i32 = arith.constant 0 : i32
    %c0_i32_0 = arith.constant 0 : i32
    %c0_i32_1 = arith.constant 0 : i32
    return %c0_i32, %c0_i32_0 : i32, i32
  }
  func.func @transform_7(%arg0: i32) -> (i32, i32) {
    %c0_i32 = arith.constant 0 : i32
    %c0_i32_0 = arith.constant 0 : i32
    %c0_i32_1 = arith.constant 0 : i32
    return %c0_i32, %c0_i32_0 : i32, i32
  }
  func.func @transform_8(%arg0: i32) -> (i32, i32) {
    %c0_i32 = arith.constant 0 : i32
    %c0_i32_0 = arith.constant 0 : i32
    %c0_i32_1 = arith.constant 0 : i32
    return %c0_i32, %c0_i32_0 : i32, i32
  }
  func.func @transform_9(%arg0: i32) -> (i32, i32) {
    %c0_i32 = arith.constant 0 : i32
    %c0_i32_0 = arith.constant 0 : i32
    return %arg0, %c0_i32 : i32, i32
  }
}

</mosaic_0001>

<bundles_post_ra>
// kernel: lstm_forward.1
= control target key start
LH: loop header
LB: loop body
LE: loop exit
PB: predicated region body
PF: predicated region fallthrough
CT: control target
= control target key end

     0   :  { %vm81_vm0 = vcmask 261120   ;;  %v2047_v20 = vmov 0   ;;  %s2540_s1 = inlined_call_operand.vmem [shape: bf16[4,32,32], index: 1, kind: input, shape index: {}]   ;;  %s2541_s0 = inlined_call_operand.vmem [shape: bf16[1,64,32], index: 0, kind: input, shape index: {}]   ;;  %s2542_s2 = inlined_call_operand.vmem [shape: bf16[4,32,32], index: 2, kind: input, shape index: {}]   ;;  %s2543_s3 = inlined_call_operand.vmem [shape: f32[4,1,32], index: 3, kind: input, shape index: {}]   ;;  %s2544_s4 = inlined_call_operand.vmem [shape: bf16[4,32,32], index: 4, kind: input, shape index: {}]   ;;  %s2545_s5 = inlined_call_operand.vmem [shape: f32[4,1,32], index: 5, kind: input, shape index: {}]   ;;  %s2546_s6 = inlined_call_operand.vmem [shape: bf16[32,128], index: 6, kind: input, shape index: {}]   ;;  %s2547_s7 = inlined_call_operand.vmem [shape: bf16[32,128], index: 7, kind: input, shape index: {}]   ;;  %s2548_s8 = inlined_call_operand.vmem [shape: f32[1,128], index: 8, kind: input, shape index: {}]   ;;  %s2549_s9 = inlined_call_operand.vmem [shape: f32[8,128], index: 9, kind: output, shape index: {}]  }
   0x1   :  { %v1858_v0 = vld [vmem:[%s2540_s1 + $0x8] sm:$0xff]  ;;  %v1860_v1 = vld [vmem:[%s2540_s1 + $0x18] sm:$0xff]  ;;  %v1857_v4 = vld [vmem:[%s2540_s1] sm:$0xff] }
   0x2   :  { %v1862_v2 = vld [vmem:[%s2540_s1 + $0x28] sm:$0xff]  ;;  %v1864_v3 = vld [vmem:[%s2540_s1 + $0x38] sm:$0xff]  ;;  %100 = vmatpush.bf16.msra.mxu0 %v1858_v0  ;;  %151 = vmatpush.bf16.msra.mxu1 %v1860_v1  ;;  %v1859_v5 = vld [vmem:[%s2540_s1 + $0x10] sm:$0xff] }
   0x3   :  { %202 = vmatpush.bf16.msra.mxu2 %v1862_v2  ;;  %253 = vmatpush.bf16.msra.mxu3 %v1864_v3  ;;  %v1861_v6 = vld [vmem:[%s2540_s1 + $0x20] sm:$0xff]  ;;  %v1863_v7 = vld [vmem:[%s2540_s1 + $0x30] sm:$0xff]  ;;  %v2128_v9 = vld [vmem:[%s2542_s2 + $0x8] sm:$0xff] }
   0x4   :  { %v1853_v8 = vld [vmem:[%s2541_s0] sm:$0xff]  ;;  %v2133_v10 = vld [vmem:[%s2542_s2 + $0x18] sm:$0xff]  ;;  %v2143_v12 = vld [vmem:[%s2542_s2 + $0x28] sm:$0xff] }
   0x5   :  { %v2138_v11 = vld [vmem:[%s2542_s2 + $0x38] sm:$0xff]  ;;  %v2154_v13 = vld [vmem:[%s2542_s2] sm:$0xff]  ;;  %v2159_v14 = vld [vmem:[%s2542_s2 + $0x10] sm:$0xff] }
   0x6   :  { %101 = vmatpush.bf16.msra.mxu0 %v1857_v4  ;;  %152 = vmatpush.bf16.msra.mxu1 %v1859_v5  ;;  %v2166_v15 = vld [vmem:[%s2542_s2 + $0x30] sm:$0xff]  ;;  %v2171_v16 = vld [vmem:[%s2542_s2 + $0x20] sm:$0xff]  ;;  %v1854_v17 = vld [vmem:[%s2541_s0 + $0x8] sm:$0xff] }
   0x7   :  { %203 = vmatpush.bf16.msra.mxu2 %v1861_v6  ;;  %254 = vmatpush.bf16.msra.mxu3 %v1863_v7  ;;  %v1855_v18 = vld [vmem:[%s2541_s0 + $0x10] sm:$0xff]  ;;  %v1856_v19 = vld [vmem:[%s2541_s0 + $0x18] sm:$0xff]  ;;  %v2225_v27 = vld [vmem:[%s2543_s3] ss:$0 sm:$0xff] }
   0x8   :  { %v2230_v28 = vld [vmem:[%s2543_s3 + $0x1] ss:$0 sm:$0xff]  ;;  %v2245_v35 = vld [vmem:[%s2543_s3 + $0x2] ss:$0 sm:$0xff]  ;;  %v2250_v36 = vld [vmem:[%s2543_s3 + $0x3] ss:$0 sm:$0xff] }
   0x9   :  { %1630 = vmatmul.msk.bf16.vlgmr.msra.gmra.mxu0 %vm81_vm0, %v1853_v8  ;;  %1647 = vmatmul.msk.bf16.vlgmr.msra.gmra.mxu1 %vm81_vm0, %v1853_v8 }
   0xa   :  { %316 = vmatpush.bf16.msrb.mxu0 %v2128_v9  ;;  %342 = vmatpush.bf16.msrb.mxu1 %v2133_v10 }
   0xb   :  { %1664 = vmatmul.msk.bf16.vlgmr.msra.gmra.mxu2 %vm81_vm0, %v1853_v8  ;;  %1681 = vmatmul.msk.bf16.vlgmr.msra.gmra.mxu3 %vm81_vm0, %v1853_v8 }
   0xc   :  { %394 = vmatpush.bf16.msrb.mxu3 %v2138_v11  ;;  %368 = vmatpush.bf16.msrb.mxu2 %v2143_v12 }
   0xe   :  { %317 = vmatpush.bf16.msrb.mxu0 %v2154_v13  ;;  %343 = vmatpush.bf16.msrb.mxu1 %v2159_v14 }
  0x10   :  { %395 = vmatpush.bf16.msrb.mxu3 %v2166_v15  ;;  %369 = vmatpush.bf16.msrb.mxu2 %v2171_v16 }
  0x12   :  { %475 = vmatpush.bf16.msra.mxu0 %v2128_v9  ;;  %489 = vmatpush.bf16.msra.mxu1 %v2133_v10 }
  0x14   :  { %517 = vmatpush.bf16.msra.mxu3 %v2138_v11  ;;  %503 = vmatpush.bf16.msra.mxu2 %v2143_v12 }
  0x16   :  { %476 = vmatpush.bf16.msra.mxu0 %v2154_v13  ;;  %490 = vmatpush.bf16.msra.mxu1 %v2159_v14 }
  0x18   :  { %504 = vmatpush.bf16.msra.mxu2 %v2171_v16  ;;  %518 = vmatpush.bf16.msra.mxu3 %v2166_v15 }
  0x19   :  { %1631 = vmatmul.msk.bf16.gmra.mxu0 %vm81_vm0, %v1854_v17  ;;  %1648 = vmatmul.msk.bf16.gmra.mxu1 %vm81_vm0, %v1854_v17 }
  0x1b   :  { %1665 = vmatmul.msk.bf16.gmra.mxu2 %vm81_vm0, %v1854_v17  ;;  %1682 = vmatmul.msk.bf16.gmra.mxu3 %vm81_vm0, %v1854_v17 }
  0x29   :  { %1632 = vmatmul.msk.bf16.gmra.mxu0 %vm81_vm0, %v1855_v18  ;;  %1649 = vmatmul.msk.bf16.gmra.mxu1 %vm81_vm0, %v1855_v18 }
  0x2b   :  { %1666 = vmatmul.msk.bf16.gmra.mxu2 %vm81_vm0, %v1855_v18  ;;  %1683 = vmatmul.msk.bf16.gmra.mxu3 %vm81_vm0, %v1855_v18 }
  0x39   :  { %1633 = vmatmul.msk.bf16.gmra.mxu0 %vm81_vm0, %v1856_v19  ;;  %1650 = vmatmul.msk.bf16.gmra.mxu1 %vm81_vm0, %v1856_v19 }
  0x3b   :  { %1667 = vmatmul.msk.bf16.gmra.mxu2 %vm81_vm0, %v1856_v19  ;;  %1684 = vmatmul.msk.bf16.gmra.mxu3 %vm81_vm0, %v1856_v19 }
  0x49   :  { %318 = vmatmul.bf16.vlgmr.msrb.gmra.mxu0 %v2047_v20  ;;  %344 = vmatmul.bf16.vlgmr.msrb.gmra.mxu1 %v2047_v20 }
  0x4a   :  { %598 = vmatpush.bf16.msrb.mxu0 %v2128_v9  ;;  %612 = vmatpush.bf16.msrb.mxu1 %v2133_v10 }
  0x4b   :  { %370 = vmatmul.bf16.vlgmr.msrb.gmra.mxu2 %v2047_v20  ;;  %396 = vmatmul.bf16.vlgmr.msrb.gmra.mxu3 %v2047_v20 }
  0x4c   :  { %640 = vmatpush.bf16.msrb.mxu3 %v2138_v11  ;;  %626 = vmatpush.bf16.msrb.mxu2 %v2143_v12 }
  0x4e   :  { %599 = vmatpush.bf16.msrb.mxu0 %v2154_v13  ;;  %613 = vmatpush.bf16.msrb.mxu1 %v2159_v14 }
  0x50   :  { %627 = vmatpush.bf16.msrb.mxu2 %v2171_v16  ;;  %641 = vmatpush.bf16.msrb.mxu3 %v2166_v15 }
  0x86   :  { %v103_v21 = vpop.f32.mrf.mxu0  ;;  %v154_v22 = vpop.f32.mrf.mxu1 }
  0x87   :  { %v104_v19 = vadd.f32 %v2225_v27, %v103_v21  ;;  %v155_v20 = vadd.f32 %v2230_v28, %v154_v22 }
  0x8e   :  { %v2214_v23 = vpop.f32.mrf.mxu2  ;;  %v2216_v24 = vpop.f32.mrf.mxu3 }
  0x8f   :  { %v2218_v25 = vpop.f32.mrf.mxu0  ;;  %v2220_v26 = vpop.f32.mrf.mxu1  ;;  %v257_v21 = vadd.f32 %v2250_v36, %v2216_v24  ;;  %v206_v24 = vadd.f32 %v2245_v35, %v2214_v23 }
  0x96   :  { %v2232_v29 = vpop.f32.mrf.mxu2  ;;  %v2234_v30 = vpop.f32.mrf.mxu3 }
  0x97   :  { %v108_v31 = vpop.f32.mrf.mxu0  ;;  %v159_v32 = vpop.f32.mrf.mxu1 }
  0x98   :  { %v2237_v33 = vadd.f32 %v2225_v27, %v108_v31  ;;  %v2240_v34 = vadd.f32 %v2230_v28, %v159_v32 }
  0x9e   :  { %v210_v37 = vpop.f32.mrf.mxu2  ;;  %v261_v38 = vpop.f32.mrf.mxu3 }
  0x9f   :  { %v2253_v39 = vadd.f32 %v2245_v35, %v210_v37  ;;  %v2256_v40 = vadd.f32 %v2250_v36, %v261_v38  ;;  %v2258_v41 = vpop.f32.mrf.mxu0  ;;  %v2260_v42 = vpop.f32.mrf.mxu1 }
  0xa6   :  { %v212_v43 = vpop.f32.mrf.mxu2  ;;  %v263_v44 = vpop.f32.mrf.mxu3 }
  0xa7   :  { %v2263_v45 = vadd.f32 %v2245_v35, %v212_v43  ;;  %v2266_v46 = vadd.f32 %v2250_v36, %v263_v44  ;;  %v113_v47 = vpop.f32.mrf.mxu0  ;;  %v164_v48 = vpop.f32.mrf.mxu1 }
  0xa8   :  { %v2269_v49 = vadd.f32 %v2225_v27, %v113_v47  ;;  %v2272_v50 = vadd.f32 %v2230_v28, %v164_v48 }
  0xae   :  { %v215_v51 = vpop.f32.mrf.mxu2  ;;  %v266_v52 = vpop.f32.mrf.mxu3 }
  0xaf   :  { %v2275_v53 = vadd.f32 %v2245_v35, %v215_v51  ;;  %v2278_v54 = vadd.f32 %v2250_v36, %v266_v52  ;;  %v115_v55 = vpop.f32.mrf.mxu0  ;;  %v166_v56 = vpop.f32.mrf.mxu1 }
  0xb0   :  { %v2281_v57 = vadd.f32 %v2225_v27, %v115_v55  ;;  %v2284_v58 = vadd.f32 %v2230_v28, %v166_v56 }
  0xb6   :  { %v217_v59 = vpop.f32.mrf.mxu2  ;;  %v268_v60 = vpop.f32.mrf.mxu3 }
  0xb7   :  { %v2287_v61 = vadd.f32 %v2245_v35, %v217_v59  ;;  %v2290_v62 = vadd.f32 %v2250_v36, %v268_v60  ;;  %v118_v63 = vpop.f32.mrf.mxu0  ;;  %v169_v0 = vpop.f32.mrf.mxu1 }
  0xb8   :  { %v2293_v1 = vadd.f32 %v2225_v27, %v118_v63  ;;  %v2296_v2 = vadd.f32 %v2230_v28, %v169_v0 }
  0xbe   :  { %v220_v3 = vpop.f32.mrf.mxu2  ;;  %v271_v4 = vpop.f32.mrf.mxu3 }
  0xbf   :  { %v2299_v5 = vadd.f32 %v2245_v35, %v220_v3  ;;  %v2302_v6 = vadd.f32 %v2250_v36, %v271_v4  ;;  %v120_v7 = vpop.f32.mrf.mxu0  ;;  %v171_v8 = vpop.f32.mrf.mxu1 }
  0xc0   :  { %v2305_v17 = vadd.f32 %v2225_v27, %v120_v7  ;;  %v2308_v18 = vadd.f32 %v2230_v28, %v171_v8 }
  0xc6   :  { %v222_v31 = vpop.f32.mrf.mxu2  ;;  %v273_v32 = vpop.f32.mrf.mxu3 }
  0xc7   :  { %v2313_v37 = vadd.f32 %v2245_v35, %v222_v31  ;;  %v2316_v38 = vadd.f32 %v2250_v36, %v273_v32  ;;  %v319_v43 = vpop.f32.mrf.mxu0  ;;  %v345_v44 = vpop.f32.mrf.mxu1 }
  0xc8   :  { %v323_v47 = vadd.f32 %v319_v43, %v104_v19  ;;  %v349_v48 = vadd.f32 %v345_v44, %v155_v20 }
  0xc9   :  { %2550 = vst [vmem:[#allocation2_spill] sm:$0xff] %v2313_v37 }
  0xca   :  { %2551 = vst [vmem:[#allocation3_spill] sm:$0xff] %v2316_v38  ;;  %v1729_v51 = vmul.f32 -1.442695, %v323_v47  ;;  %v1730_v52 = vmul.f32 -1.442695, %v349_v48 }
  0xcc   :  { %1895 = vpow2.f32 %v1729_v51 }
  0xcd   :  { %1897 = vpow2.f32 %v1730_v52 }
  0xce   :  { %v371_v22 = vpop.f32.mrf.mxu2  ;;  %v397_v55 = vpop.f32.mrf.mxu3 }
  0xcf   :  { %v401_v56 = vadd.f32 %v397_v55, %v257_v21  ;;  %v321_v59 = vpop.f32.mrf.mxu0  ;;  %v347_v60 = vpop.f32.mrf.mxu1  ;;  %v375_v43 = vadd.f32 %v371_v22, %v206_v24 }
  0xd1   :  { %v1731_v63 = vmul.f32 -1.442695, %v401_v56 }
  0xd2   :  { %v1896_v0 = vpop.eup %1895 }
  0xd3   :  { %v1898_v3 = vpop.eup %1897  ;;  %v405_v4 = vadd.f32 1.0, %v1896_v0  ;;  %1899 = vpow2.f32 %v1731_v63 }
  0xd4   :  { %v424_v7 = vadd.f32 1.0, %v1898_v3 }
  0xd5   :  { %1901 = vrcp.f32 %v405_v4  ;;  %v417_v21 = vand.u32 2147483648, %v405_v4  ;;  %v415_v59 = vand.u32 2147483647, %v405_v4  ;;  %vm411_vm3 = vweird.f32 %v405_v4 }
  0xd6   :  { %1903 = vrcp.f32 %v424_v7  ;;  %v399_v8 = vpop.f32.mrf.mxu3  ;;  %v373_v19 = vpop.f32.mrf.mxu2  ;;  %v436_v55 = vand.u32 2147483648, %v424_v7  ;;  %v434_v63 = vand.u32 2147483647, %v424_v7  ;;  %vm430_vm4 = vweird.f32 %v424_v7 }
  0xd7   :  { %v418_v22 = vor.u32 1.1754944e-38, %v417_v21  ;;  %vm416_vm6 = vcmp.eq.f32.partialorder %v415_v59, 8.507059e+37 }
  0xd8   :  { %v437_v19 = vor.u32 1.1754944e-38, %v436_v55  ;;  %vm435_vm8 = vcmp.eq.f32.partialorder %v434_v63, 8.507059e+37 }
  0xd9   :  { %v1900_v20 = vpop.eup %1899 }
  0xda   :  { %v444_v31 = vadd.f32 1.0, %v1900_v20 }
  0xdb   :  { %v1902_v32 = vpop.eup %1901 }
  0xdc   :  { %v1904_v44 = vpop.eup %1903  ;;  %v407_v47 = vmul.f32 %v1902_v32, %v405_v4  ;;  %1905 = vrcp.f32 %v444_v31  ;;  %vm412_vm1 = vweird.f32 %v1902_v32  ;;  %vm450_vm10 = vweird.f32 %v444_v31 }
  0xdd   :  { %v426_v48 = vmul.f32 %v1904_v44, %v424_v7  ;;  %1907 = vtanh.f32 %v375_v43  ;;  %vm431_vm2 = vweird.f32 %v1904_v44  ;;  %vm413_vm5 = vmor %vm411_vm3, %vm412_vm1  ;;  %v456_v7 = vand.u32 2147483648, %v444_v31 }
  0xde   :  { %v408_v51 = vsub.f32 1.0, %v407_v47  ;;  %vm432_vm7 = vmor %vm430_vm4, %vm431_vm2 }
  0xdf   :  { %v427_v52 = vsub.f32 1.0, %v426_v48  ;;  %v457_v55 = vor.u32 1.1754944e-38, %v456_v7 }
  0xe0   :  { %v409_v56 = vmul.f32 %v1902_v32, %v408_v51 }
  0xe1   :  { %v428_v60 = vmul.f32 %v1904_v44, %v427_v52 }
  0xe2   :  { %v1906_v0 = vpop.eup %1905  ;;  %v410_v23 = vadd.f32 %v1902_v32, %v409_v56 }
  0xe3   :  { %v429_v3 = vadd.f32 %v1904_v44, %v428_v60  ;;  %v446_v8 = vmul.f32 %v1906_v0, %v444_v31  ;;  %v1908_v24 = vpop.eup %1907  ;;  %vm451_vm9 = vweird.f32 %v1906_v0 }
  0xe4   :  { %v414_v20 = vsel %vm413_vm5, %v1902_v32, %v410_v23  ;;  %v454_v32 = vand.u32 2147483647, %v444_v31  ;;  %vm452_vm11 = vmor %vm450_vm10, %vm451_vm9 }
  0xe5   :  { %v419_v43 = vsel %vm416_vm6, %v418_v22, %v414_v20  ;;  %v433_v47 = vsel %vm432_vm7, %v1904_v44, %v429_v3  ;;  %v447_v48 = vsub.f32 1.0, %v446_v8 }
  0xe6   :  { %v438_v51 = vsel %vm435_vm8, %v437_v19, %v433_v47  ;;  %v461_v52 = vmul.f32 %v1908_v24, %v419_v43  ;;  %vm455_vm12 = vcmp.eq.f32.partialorder %v454_v32, 8.507059e+37  ;;  %v259_v19 = vadd.f32 %v2250_v36, %v2234_v30 }
  0xe7   :  { %v460_v37 = vmul.f32 0.0, %v438_v51  ;;  %v448_v38 = vmul.f32 %v1906_v0, %v447_v48  ;;  %v208_v30 = vadd.f32 %v2245_v35, %v2232_v29 }
  0xe9   :  { %v2322_v56 = vadd.f32 %v461_v52, %v460_v37  ;;  %v449_v4 = vadd.f32 %v1906_v0, %v448_v38  ;;  %v106_v37 = vadd.f32 %v2225_v27, %v2218_v25  ;;  %v157_v38 = vadd.f32 %v2230_v28, %v2220_v26 }
  0xeb   :  { %1909 = vtanh.f32 %v2322_v56  ;;  %v453_v21 = vsel %vm452_vm11, %v1906_v0, %v449_v4 }
  0xec   :  { %v458_v59 = vsel %vm455_vm12, %v457_v55, %v453_v21 }
  0xf1   :  { %v1910_v44 = vpop.eup %1909 }
  0xf2   :  { %v464_v60 = vmul.f32 %v1910_v44, %v458_v59 }
  0xf4   :  { %v465_v63 = vpack.c.bf16 %v464_v60, %v464_v60 }
  0xf6   :  { %1732 = vmatmul.msk.bf16.vlgmr.msra.gmra.mxu0 %vm81_vm0, %v465_v63  ;;  %1733 = vmatmul.msk.bf16.vlgmr.msra.gmra.mxu1 %vm81_vm0, %v465_v63 }
  0xf7   :  { %1734 = vmatmul.msk.bf16.vlgmr.msra.gmra.mxu2 %vm81_vm0, %v465_v63  ;;  %1735 = vmatmul.msk.bf16.vlgmr.msra.gmra.mxu3 %vm81_vm0, %v465_v63 }
  0xf8   :  { %721 = vmatpush.bf16.msra.mxu0 %v2128_v9  ;;  %735 = vmatpush.bf16.msra.mxu1 %v2133_v10 }
  0xf9   :  { %763 = vmatpush.bf16.msra.mxu3 %v2138_v11  ;;  %749 = vmatpush.bf16.msra.mxu2 %v2143_v12 }
  0xfc   :  { %722 = vmatpush.bf16.msra.mxu0 %v2154_v13  ;;  %736 = vmatpush.bf16.msra.mxu1 %v2159_v14 }
  0xfd   :  { %750 = vmatpush.bf16.msra.mxu2 %v2171_v16  ;;  %764 = vmatpush.bf16.msra.mxu3 %v2166_v15 }
 0x173   :  { %v478_v31 = vpop.f32.mrf.mxu0  ;;  %v492_v0 = vpop.f32.mrf.mxu1 }
 0x174   :  { %v482_v23 = vadd.f32 %v478_v31, %v106_v37  ;;  %v496_v22 = vadd.f32 %v492_v0, %v157_v38 }
 0x176   :  { %v1736_v3 = vmul.f32 -1.442695, %v482_v23  ;;  %v1737_v8 = vmul.f32 -1.442695, %v496_v22 }
 0x178   :  { %1911 = vpow2.f32 %v1736_v3 }
 0x179   :  { %1913 = vpow2.f32 %v1737_v8 }
 0x17a   :  { %v506_v20 = vpop.f32.mrf.mxu2  ;;  %v520_v24 = vpop.f32.mrf.mxu3 }
 0x17b   :  { %v524_v43 = vadd.f32 %v520_v24, %v259_v19  ;;  %v480_v47 = vpop.f32.mrf.mxu0  ;;  %v494_v48 = vpop.f32.mrf.mxu1  ;;  %v510_v44 = vadd.f32 %v506_v20, %v208_v30 }
 0x17d   :  { %v1738_v25 = vmul.f32 -1.442695, %v524_v43 }
 0x17e   :  { %v1912_v51 = vpop.eup %1911 }
 0x17f   :  { %v1914_v52 = vpop.eup %1913  ;;  %v528_v26 = vadd.f32 1.0, %v1912_v51  ;;  %1915 = vpow2.f32 %v1738_v25 }
 0x180   :  { %v547_v4 = vadd.f32 1.0, %v1914_v52 }
 0x181   :  { %1917 = vrcp.f32 %v528_v26  ;;  %v540_v31 = vand.u32 2147483648, %v528_v26  ;;  %v538_v22 = vand.u32 2147483647, %v528_v26  ;;  %vm534_vm15 = vweird.f32 %v528_v26 }
 0x182   :  { %1919 = vrcp.f32 %v547_v4  ;;  %v508_v7 = vpop.f32.mrf.mxu2  ;;  %v522_v32 = vpop.f32.mrf.mxu3  ;;  %v559_v0 = vand.u32 2147483648, %v547_v4  ;;  %v557_v8 = vand.u32 2147483647, %v547_v4  ;;  %vm553_vm1 = vweird.f32 %v547_v4 }
 0x183   :  { %v541_v35 = vor.u32 1.1754944e-38, %v540_v31  ;;  %vm539_vm4 = vcmp.eq.f32.partialorder %v538_v22, 8.507059e+37 }
 0x184   :  { %v560_v43 = vor.u32 1.1754944e-38, %v559_v0  ;;  %vm558_vm5 = vcmp.eq.f32.partialorder %v557_v8, 8.507059e+37 }
 0x185   :  { %v1916_v21 = vpop.eup %1915 }
 0x186   :  { %v567_v36 = vadd.f32 1.0, %v1916_v21 }
 0x187   :  { %v1918_v55 = vpop.eup %1917 }
 0x188   :  { %v1920_v59 = vpop.eup %1919  ;;  %v530_v60 = vmul.f32 %v1918_v55, %v528_v26  ;;  %1921 = vrcp.f32 %v567_v36  ;;  %vm535_vm13 = vweird.f32 %v1918_v55  ;;  %vm573_vm7 = vweird.f32 %v567_v36 }
 0x189   :  { %v549_v63 = vmul.f32 %v1920_v59, %v547_v4  ;;  %1923 = vtanh.f32 %v510_v44  ;;  %vm554_vm14 = vweird.f32 %v1920_v59  ;;  %vm536_vm2 = vmor %vm534_vm15, %vm535_vm13  ;;  %v579_v44 = vand.u32 2147483648, %v567_v36 }
 0x18a   :  { %v531_v37 = vsub.f32 1.0, %v530_v60  ;;  %vm555_vm3 = vmor %vm553_vm1, %vm554_vm14 }
 0x18b   :  { %v550_v38 = vsub.f32 1.0, %v549_v63  ;;  %v580_v63 = vor.u32 1.1754944e-38, %v579_v44 }
 0x18c   :  { %v532_v23 = vmul.f32 %v1918_v55, %v531_v37 }
 0x18d   :  { %v551_v3 = vmul.f32 %v1920_v59, %v550_v38 }
 0x18e   :  { %v1922_v19 = vpop.eup %1921  ;;  %v533_v29 = vadd.f32 %v1918_v55, %v532_v23 }
 0x18f   :  { %v552_v20 = vadd.f32 %v1920_v59, %v551_v3  ;;  %v569_v24 = vmul.f32 %v1922_v19, %v567_v36  ;;  %v1924_v48 = vpop.eup %1923  ;;  %vm574_vm6 = vweird.f32 %v1922_v19 }
 0x190   :  { %v537_v47 = vsel %vm536_vm2, %v1918_v55, %v533_v29  ;;  %v577_v55 = vand.u32 2147483647, %v567_v36  ;;  %vm575_vm8 = vmor %vm573_vm7, %vm574_vm6 }
 0x191   :  { %v542_v25 = vsel %vm539_vm4, %v541_v35, %v537_v47  ;;  %v556_v51 = vsel %vm555_vm3, %v1920_v59, %v552_v20  ;;  %v570_v52 = vsub.f32 1.0, %v569_v24 }
 0x192   :  { %v561_v7 = vsel %vm558_vm5, %v560_v43, %v556_v51  ;;  %v584_v32 = vmul.f32 %v1924_v48, %v542_v25  ;;  %vm578_vm9 = vcmp.eq.f32.partialorder %v577_v55, 8.507059e+37 }
 0x193   :  { %v583_v21 = vmul.f32 %v561_v7, %v2322_v56  ;;  %v571_v30 = vmul.f32 %v1922_v19, %v570_v52 }
 0x195   :  { %v2346_v26 = vadd.f32 %v584_v32, %v583_v21  ;;  %v572_v4 = vadd.f32 %v1922_v19, %v571_v30 }
 0x197   :  { %1925 = vtanh.f32 %v2346_v26  ;;  %v576_v60 = vsel %vm575_vm8, %v1922_v19, %v572_v4 }
 0x198   :  { %v581_v37 = vsel %vm578_vm9, %v580_v63, %v576_v60 }
 0x19d   :  { %v1926_v59 = vpop.eup %1925 }
 0x19e   :  { %v587_v38 = vmul.f32 %v1926_v59, %v581_v37 }
 0x1a0   :  { %v588_v31 = vpack.c.bf16 %v587_v38, %v587_v38 }
 0x1a2   :  { %1739 = vmatmul.msk.bf16.vlgmr.msrb.gmra.mxu0 %vm81_vm0, %v588_v31  ;;  %1740 = vmatmul.msk.bf16.vlgmr.msrb.gmra.mxu1 %vm81_vm0, %v588_v31 }
 0x1a3   :  { %1741 = vmatmul.msk.bf16.vlgmr.msrb.gmra.mxu2 %vm81_vm0, %v588_v31  ;;  %1742 = vmatmul.msk.bf16.vlgmr.msrb.gmra.mxu3 %vm81_vm0, %v588_v31 }
 0x1a4   :  { %844 = vmatpush.bf16.msrb.mxu0 %v2128_v9  ;;  %858 = vmatpush.bf16.msrb.mxu1 %v2133_v10 }
 0x1a5   :  { %886 = vmatpush.bf16.msrb.mxu3 %v2138_v11  ;;  %872 = vmatpush.bf16.msrb.mxu2 %v2143_v12 }
 0x1a8   :  { %845 = vmatpush.bf16.msrb.mxu0 %v2154_v13  ;;  %859 = vmatpush.bf16.msrb.mxu1 %v2159_v14 }
 0x1a9   :  { %873 = vmatpush.bf16.msrb.mxu2 %v2171_v16  ;;  %887 = vmatpush.bf16.msrb.mxu3 %v2166_v15 }
 0x21f   :  { %v601_v56 = vpop.f32.mrf.mxu0  ;;  %v615_v36 = vpop.f32.mrf.mxu1 }
 0x220   :  { %v605_v0 = vadd.f32 %v601_v56, %v2237_v33  ;;  %v619_v23 = vadd.f32 %v615_v36, %v2240_v34 }
 0x222   :  { %v1743_v22 = vmul.f32 -1.442695, %v605_v0  ;;  %v1744_v3 = vmul.f32 -1.442695, %v619_v23 }
 0x224   :  { %1927 = vpow2.f32 %v1743_v22 }
 0x225   :  { %1929 = vpow2.f32 %v1744_v3 }
 0x226   :  { %v629_v8 = vpop.f32.mrf.mxu2  ;;  %v643_v19 = vpop.f32.mrf.mxu3 }
 0x227   :  { %v647_v29 = vadd.f32 %v643_v19, %v2256_v40  ;;  %v603_v35 = vpop.f32.mrf.mxu0  ;;  %v617_v20 = vpop.f32.mrf.mxu1  ;;  %v633_v32 = vadd.f32 %v629_v8, %v2253_v39 }
 0x229   :  { %v1745_v24 = vmul.f32 -1.442695, %v647_v29 }
 0x22a   :  { %v1928_v43 = vpop.eup %1927 }
 0x22b   :  { %v1930_v47 = vpop.eup %1929  ;;  %v651_v48 = vadd.f32 1.0, %v1928_v43  ;;  %1931 = vpow2.f32 %v1745_v24 }
 0x22c   :  { %v670_v25 = vadd.f32 1.0, %v1930_v47 }
 0x22d   :  { %1933 = vrcp.f32 %v651_v48  ;;  %v663_v55 = vand.u32 2147483648, %v651_v48  ;;  %v661_v59 = vand.u32 2147483647, %v651_v48  ;;  %vm657_vm12 = vweird.f32 %v651_v48 }
 0x22e   :  { %1935 = vrcp.f32 %v670_v25  ;;  %v631_v33 = vpop.f32.mrf.mxu2  ;;  %v645_v34 = vpop.f32.mrf.mxu3  ;;  %v682_v60 = vand.u32 2147483648, %v670_v25  ;;  %v680_v38 = vand.u32 2147483647, %v670_v25  ;;  %vm676_vm13 = vweird.f32 %v670_v25 }
 0x22f   :  { %v664_v39 = vor.u32 1.1754944e-38, %v663_v55  ;;  %vm662_vm1 = vcmp.eq.f32.partialorder %v661_v59, 8.507059e+37 }
 0x230   :  { %v683_v23 = vor.u32 1.1754944e-38, %v682_v60  ;;  %vm681_vm2 = vcmp.eq.f32.partialorder %v680_v38, 8.507059e+37 }
 0x231   :  { %v1932_v51 = vpop.eup %1931 }
 0x232   :  { %v690_v52 = vadd.f32 1.0, %v1932_v51 }
 0x233   :  { %v1934_v7 = vpop.eup %1933 }
 0x234   :  { %v1936_v21 = vpop.eup %1935  ;;  %v653_v30 = vmul.f32 %v1934_v7, %v651_v48  ;;  %1937 = vrcp.f32 %v690_v52  ;;  %vm658_vm10 = vweird.f32 %v1934_v7  ;;  %vm696_vm4 = vweird.f32 %v690_v52 }
 0x235   :  { %v672_v40 = vmul.f32 %v1936_v21, %v670_v25  ;;  %1939 = vtanh.f32 %v633_v32  ;;  %vm677_vm11 = vweird.f32 %v1936_v21  ;;  %vm659_vm14 = vmor %vm657_vm12, %vm658_vm10  ;;  %v702_v25 = vand.u32 2147483648, %v690_v52 }
 0x236   :  { %v654_v4 = vsub.f32 1.0, %v653_v30  ;;  %vm678_vm15 = vmor %vm676_vm13, %vm677_vm11  ;;  %v700_v33 = vand.u32 2147483647, %v690_v52 }
 0x237   :  { %v673_v44 = vsub.f32 1.0, %v672_v40  ;;  %v703_v51 = vor.u32 1.1754944e-38, %v702_v25 }
 0x238   :  { %v655_v63 = vmul.f32 %v1934_v7, %v654_v4  ;;  %vm701_vm6 = vcmp.eq.f32.partialorder %v700_v33, 8.507059e+37 }
 0x239   :  { %v674_v37 = vmul.f32 %v1936_v21, %v673_v44 }
 0x23a   :  { %v1938_v31 = vpop.eup %1937  ;;  %v656_v56 = vadd.f32 %v1934_v7, %v655_v63 }
 0x23b   :  { %v675_v36 = vadd.f32 %v1936_v21, %v674_v37  ;;  %v692_v0 = vmul.f32 %v1938_v31, %v690_v52  ;;  %v1940_v3 = vpop.eup %1939  ;;  %vm697_vm3 = vweird.f32 %v1938_v31  ;;  %v162_v52 = vadd.f32 %v2230_v28, %v2260_v42 }
 0x23c   :  { %v660_v22 = vsel %vm659_vm14, %v1934_v7, %v656_v56  ;;  %vm698_vm5 = vmor %vm696_vm4, %vm697_vm3 }
 0x23d   :  { %v665_v8 = vsel %vm662_vm1, %v664_v39, %v660_v22  ;;  %v679_v19 = vsel %vm678_vm15, %v1936_v21, %v675_v36  ;;  %v693_v29 = vsub.f32 1.0, %v692_v0 }
 0x23e   :  { %v684_v35 = vsel %vm681_vm2, %v683_v23, %v679_v19  ;;  %v707_v20 = vmul.f32 %v1940_v3, %v665_v8 }
 0x23f   :  { %v706_v24 = vmul.f32 %v684_v35, %v2346_v26  ;;  %v694_v43 = vmul.f32 %v1938_v31, %v693_v29  ;;  %v111_v26 = vadd.f32 %v2225_v27, %v2258_v41 }
 0x241   :  { %v2366_v47 = vadd.f32 %v707_v20, %v706_v24  ;;  %v695_v48 = vadd.f32 %v1938_v31, %v694_v43 }
 0x243   :  { %1941 = vtanh.f32 %v2366_v47  ;;  %v699_v34 = vsel %vm698_vm5, %v1938_v31, %v695_v48 }
 0x244   :  { %v704_v32 = vsel %vm701_vm6, %v703_v51, %v699_v34 }
 0x249   :  { %v1942_v7 = vpop.eup %1941 }
 0x24a   :  { %v710_v21 = vmul.f32 %v1942_v7, %v704_v32 }
 0x24c   :  { %v711_v30 = vpack.c.bf16 %v710_v21, %v710_v21 }
 0x24e   :  { %1746 = vmatmul.msk.bf16.vlgmr.msra.gmra.mxu0 %vm81_vm0, %v711_v30  ;;  %1747 = vmatmul.msk.bf16.vlgmr.msra.gmra.mxu1 %vm81_vm0, %v711_v30 }
 0x24f   :  { %1748 = vmatmul.msk.bf16.vlgmr.msra.gmra.mxu2 %vm81_vm0, %v711_v30  ;;  %1749 = vmatmul.msk.bf16.vlgmr.msra.gmra.mxu3 %vm81_vm0, %v711_v30 }
 0x250   :  { %967 = vmatpush.bf16.msra.mxu0 %v2128_v9  ;;  %981 = vmatpush.bf16.msra.mxu1 %v2133_v10 }
 0x251   :  { %1009 = vmatpush.bf16.msra.mxu3 %v2138_v11  ;;  %995 = vmatpush.bf16.msra.mxu2 %v2143_v12 }
 0x254   :  { %968 = vmatpush.bf16.msra.mxu0 %v2154_v13  ;;  %982 = vmatpush.bf16.msra.mxu1 %v2159_v14 }
 0x255   :  { %996 = vmatpush.bf16.msra.mxu2 %v2171_v16  ;;  %1010 = vmatpush.bf16.msra.mxu3 %v2166_v15 }
 0x2cb   :  { %v724_v40 = vpop.f32.mrf.mxu0  ;;  %v738_v4 = vpop.f32.mrf.mxu1 }
 0x2cc   :  { %v728_v44 = vadd.f32 %v724_v40, %v111_v26  ;;  %v742_v55 = vadd.f32 %v738_v4, %v162_v52 }
 0x2ce   :  { %v1750_v60 = vmul.f32 -1.442695, %v728_v44  ;;  %v1751_v63 = vmul.f32 -1.442695, %v742_v55 }
 0x2d0   :  { %1943 = vpow2.f32 %v1750_v60 }
 0x2d1   :  { %1945 = vpow2.f32 %v1751_v63 }
 0x2d2   :  { %v752_v59 = vpop.f32.mrf.mxu2  ;;  %v766_v37 = vpop.f32.mrf.mxu3 }
 0x2d3   :  { %v770_v38 = vadd.f32 %v766_v37, %v2266_v46  ;;  %v726_v31 = vpop.f32.mrf.mxu0  ;;  %v740_v56 = vpop.f32.mrf.mxu1  ;;  %v756_v8 = vadd.f32 %v752_v59, %v2263_v45 }
 0x2d5   :  { %v1752_v39 = vmul.f32 -1.442695, %v770_v38 }
 0x2d6   :  { %v1944_v36 = vpop.eup %1943 }
 0x2d7   :  { %v1946_v27 = vpop.eup %1945  ;;  %v774_v41 = vadd.f32 1.0, %v1944_v36  ;;  %1947 = vpow2.f32 %v1752_v39 }
 0x2d8   :  { %v793_v28 = vadd.f32 1.0, %v1946_v27 }
 0x2d9   :  { %1949 = vrcp.f32 %v774_v41  ;;  %v786_v24 = vand.u32 2147483648, %v774_v41  ;;  %v784_v25 = vand.u32 2147483647, %v774_v41  ;;  %vm780_vm9 = vweird.f32 %v774_v41 }
 0x2da   :  { %1951 = vrcp.f32 %v793_v28  ;;  %v754_v42 = vpop.f32.mrf.mxu2  ;;  %v768_v0 = vpop.f32.mrf.mxu3  ;;  %v805_v43 = vand.u32 2147483648, %v793_v28  ;;  %v803_v34 = vand.u32 2147483647, %v793_v28  ;;  %vm799_vm10 = vweird.f32 %v793_v28 }
 0x2db   :  { %v787_v45 = vor.u32 1.1754944e-38, %v786_v24  ;;  %vm785_vm13 = vcmp.eq.f32.partialorder %v784_v25, 8.507059e+37 }
 0x2dc   :  { %v806_v30 = vor.u32 1.1754944e-38, %v805_v43  ;;  %vm804_vm14 = vcmp.eq.f32.partialorder %v803_v34, 8.507059e+37 }
 0x2dd   :  { %v1948_v23 = vpop.eup %1947 }
 0x2de   :  { %v813_v22 = vadd.f32 1.0, %v1948_v23 }
 0x2df   :  { %v1950_v3 = vpop.eup %1949 }
 0x2e0   :  { %v1952_v19 = vpop.eup %1951  ;;  %v776_v29 = vmul.f32 %v1950_v3, %v774_v41  ;;  %1953 = vrcp.f32 %v813_v22  ;;  %vm781_vm7 = vweird.f32 %v1950_v3  ;;  %v825_v31 = vand.u32 2147483648, %v813_v22 }
 0x2e1   :  { %v795_v46 = vmul.f32 %v1952_v19, %v793_v28  ;;  %1955 = vtanh.f32 %v756_v8  ;;  %vm800_vm8 = vweird.f32 %v1952_v19  ;;  %vm782_vm11 = vmor %vm780_vm9, %vm781_vm7  ;;  %vm819_vm1 = vweird.f32 %v813_v22 }
 0x2e2   :  { %v777_v35 = vsub.f32 1.0, %v776_v29  ;;  %vm801_vm12 = vmor %vm799_vm10, %vm800_vm8  ;;  %v823_v56 = vand.u32 2147483647, %v813_v22  ;;  %v826_v36 = vor.u32 1.1754944e-38, %v825_v31 }
 0x2e3   :  { %v796_v20 = vsub.f32 1.0, %v795_v46 }
 0x2e4   :  { %v778_v48 = vmul.f32 %v1950_v3, %v777_v35  ;;  %vm824_vm3 = vcmp.eq.f32.partialorder %v823_v56, 8.507059e+37 }
 0x2e5   :  { %v797_v33 = vmul.f32 %v1952_v19, %v796_v20 }
 0x2e6   :  { %v1954_v51 = vpop.eup %1953  ;;  %v779_v7 = vadd.f32 %v1950_v3, %v778_v48 }
 0x2e7   :  { %v798_v32 = vadd.f32 %v1952_v19, %v797_v33  ;;  %v815_v21 = vmul.f32 %v1954_v51, %v813_v22  ;;  %v1956_v52 = vpop.eup %1955  ;;  %vm820_vm15 = vweird.f32 %v1954_v51 }
 0x2e8   :  { %v783_v26 = vsel %vm782_vm11, %v1950_v3, %v779_v7  ;;  %vm821_vm2 = vmor %vm819_vm1, %vm820_vm15 }
 0x2e9   :  { %v788_v40 = vsel %vm785_vm13, %v787_v45, %v783_v26  ;;  %v802_v4 = vsel %vm801_vm12, %v1952_v19, %v798_v32  ;;  %v816_v44 = vsub.f32 1.0, %v815_v21 }
 0x2ea   :  { %v807_v55 = vsel %vm804_vm14, %v806_v30, %v802_v4  ;;  %v830_v60 = vmul.f32 %v1956_v52, %v788_v40 }
 0x2eb   :  { %v829_v63 = vmul.f32 %v807_v55, %v2366_v47  ;;  %v817_v59 = vmul.f32 %v1954_v51, %v816_v44 }
 0x2ed   :  { %v2388_v37 = vadd.f32 %v830_v60, %v829_v63  ;;  %v818_v38 = vadd.f32 %v1954_v51, %v817_v59 }
 0x2ef   :  { %1957 = vtanh.f32 %v2388_v37  ;;  %v822_v39 = vsel %vm821_vm2, %v1954_v51, %v818_v38 }
 0x2f0   :  { %v827_v41 = vsel %vm824_vm3, %v826_v36, %v822_v39 }
 0x2f5   :  { %v1958_v27 = vpop.eup %1957 }
 0x2f6   :  { %v833_v28 = vmul.f32 %v1958_v27, %v827_v41 }
 0x2f8   :  { %v834_v42 = vpack.c.bf16 %v833_v28, %v833_v28 }
 0x2fa   :  { %1753 = vmatmul.msk.bf16.vlgmr.msrb.gmra.mxu0 %vm81_vm0, %v834_v42  ;;  %1754 = vmatmul.msk.bf16.vlgmr.msrb.gmra.mxu1 %vm81_vm0, %v834_v42 }
 0x2fb   :  { %1755 = vmatmul.msk.bf16.vlgmr.msrb.gmra.mxu2 %vm81_vm0, %v834_v42  ;;  %1756 = vmatmul.msk.bf16.vlgmr.msrb.gmra.mxu3 %vm81_vm0, %v834_v42 }
 0x2fc   :  { %1090 = vmatpush.bf16.msrb.mxu0 %v2128_v9  ;;  %1104 = vmatpush.bf16.msrb.mxu1 %v2133_v10 }
 0x2fd   :  { %1132 = vmatpush.bf16.msrb.mxu3 %v2138_v11  ;;  %1118 = vmatpush.bf16.msrb.mxu2 %v2143_v12 }
 0x300   :  { %1091 = vmatpush.bf16.msrb.mxu0 %v2154_v13  ;;  %1105 = vmatpush.bf16.msrb.mxu1 %v2159_v14 }
 0x301   :  { %1119 = vmatpush.bf16.msrb.mxu2 %v2171_v16  ;;  %1133 = vmatpush.bf16.msrb.mxu3 %v2166_v15 }
 0x377   :  { %v847_v47 = vpop.f32.mrf.mxu0  ;;  %v861_v0 = vpop.f32.mrf.mxu1 }
 0x378   :  { %v851_v23 = vadd.f32 %v847_v47, %v2269_v49  ;;  %v865_v9 = vadd.f32 %v861_v0, %v2272_v50 }
 0x37a   :  { %v1757_v22 = vmul.f32 -1.442695, %v851_v23  ;;  %v1758_v10 = vmul.f32 -1.442695, %v865_v9 }
 0x37c   :  { %1959 = vpow2.f32 %v1757_v22 }
 0x37d   :  { %1961 = vpow2.f32 %v1758_v10  ;;  %v2040_v10 = vld [vmem:[%s2542_s2 + $0x18] sm:$0xff] }
 0x37e   :  { %v875_v11 = vpop.f32.mrf.mxu2  ;;  %v889_v12 = vpop.f32.mrf.mxu3 }
 0x37f   :  { %v893_v13 = vadd.f32 %v889_v12, %v2278_v54  ;;  %v849_v3 = vpop.f32.mrf.mxu0  ;;  %v863_v14 = vpop.f32.mrf.mxu1  ;;  %v879_v24 = vadd.f32 %v875_v11, %v2275_v53  ;;  %v2041_v11 = vld [vmem:[%s2542_s2 + $0x38] sm:$0xff]  ;;  %v2042_v12 = vld [vmem:[%s2542_s2 + $0x28] sm:$0xff] }
 0x380   :  { %v2044_v3 = vld [vmem:[%s2542_s2 + $0x10] sm:$0xff]  ;;  %v2045_v14 = vld [vmem:[%s2542_s2 + $0x20] sm:$0xff] }
 0x381   :  { %v1759_v8 = vmul.f32 -1.442695, %v893_v13  ;;  %v2043_v13 = vld [vmem:[%s2542_s2] sm:$0xff] }
 0x382   :  { %v1960_v16 = vpop.eup %1959 }
 0x383   :  { %v1962_v19 = vpop.eup %1961  ;;  %v897_v15 = vadd.f32 1.0, %v1960_v16  ;;  %1963 = vpow2.f32 %v1759_v8  ;;  %v2046_v8 = vld [vmem:[%s2542_s2 + $0x30] sm:$0xff] }
 0x384   :  { %v916_v29 = vadd.f32 1.0, %v1962_v19 }
 0x385   :  { %1965 = vrcp.f32 %v897_v15  ;;  %v909_v34 = vand.u32 2147483648, %v897_v15  ;;  %v907_v45 = vand.u32 2147483647, %v897_v15  ;;  %vm903_vm6 = vweird.f32 %v897_v15 }
 0x386   :  { %1967 = vrcp.f32 %v916_v29  ;;  %v877_v49 = vpop.f32.mrf.mxu2  ;;  %v891_v50 = vpop.f32.mrf.mxu3  ;;  %v928_v51 = vand.u32 2147483648, %v916_v29  ;;  %v926_v21 = vand.u32 2147483647, %v916_v29  ;;  %vm922_vm7 = vweird.f32 %v916_v29 }
 0x387   :  { %v910_v53 = vor.u32 1.1754944e-38, %v909_v34  ;;  %vm908_vm10 = vcmp.eq.f32.partialorder %v907_v45, 8.507059e+37 }
 0x388   :  { %v929_v4 = vor.u32 1.1754944e-38, %v928_v51  ;;  %vm927_vm11 = vcmp.eq.f32.partialorder %v926_v21, 8.507059e+37 }
 0x389   :  { %v1964_v46 = vpop.eup %1963 }
 0x38a   :  { %v936_v35 = vadd.f32 1.0, %v1964_v46 }
 0x38b   :  { %v1966_v20 = vpop.eup %1965 }
 0x38c   :  { %v1968_v43 = vpop.eup %1967  ;;  %v899_v48 = vmul.f32 %v1966_v20, %v897_v15  ;;  %1969 = vrcp.f32 %v936_v35  ;;  %vm904_vm4 = vweird.f32 %v1966_v20  ;;  %v948_v41 = vand.u32 2147483648, %v936_v35 }
 0x38d   :  { %v918_v54 = vmul.f32 %v1968_v43, %v916_v29  ;;  %1971 = vtanh.f32 %v879_v24  ;;  %vm923_vm5 = vweird.f32 %v1968_v43  ;;  %vm905_vm8 = vmor %vm903_vm6, %vm904_vm4  ;;  %vm942_vm13 = vweird.f32 %v936_v35 }
 0x38e   :  { %v900_v25 = vsub.f32 1.0, %v899_v48  ;;  %vm924_vm9 = vmor %vm922_vm7, %vm923_vm5  ;;  %v946_v28 = vand.u32 2147483647, %v936_v35  ;;  %v949_v47 = vor.u32 1.1754944e-38, %v948_v41 }
 0x38f   :  { %v919_v33 = vsub.f32 1.0, %v918_v54 }
 0x390   :  { %v901_v7 = vmul.f32 %v1966_v20, %v900_v25  ;;  %vm947_vm15 = vcmp.eq.f32.partialorder %v946_v28, 8.507059e+37 }
 0x391   :  { %v920_v32 = vmul.f32 %v1968_v43, %v919_v33 }
 0x392   :  { %v1970_v30 = vpop.eup %1969  ;;  %v902_v26 = vadd.f32 %v1966_v20, %v901_v7 }
 0x393   :  { %v921_v52 = vadd.f32 %v1968_v43, %v920_v32  ;;  %v938_v40 = vmul.f32 %v1970_v30, %v936_v35  ;;  %v1972_v55 = vpop.eup %1971  ;;  %vm943_vm12 = vweird.f32 %v1970_v30 }
 0x394   :  { %v906_v44 = vsel %vm905_vm8, %v1966_v20, %v902_v26  ;;  %vm944_vm14 = vmor %vm942_vm13, %vm943_vm12 }
 0x395   :  { %v911_v60 = vsel %vm908_vm10, %v910_v53, %v906_v44  ;;  %v925_v63 = vsel %vm924_vm9, %v1968_v43, %v921_v52  ;;  %v939_v59 = vsub.f32 1.0, %v938_v40 }
 0x396   :  { %v930_v38 = vsel %vm927_vm11, %v929_v4, %v925_v63  ;;  %v953_v31 = vmul.f32 %v1972_v55, %v911_v60 }
 0x397   :  { %v952_v56 = vmul.f32 %v930_v38, %v2388_v37  ;;  %v940_v39 = vmul.f32 %v1970_v30, %v939_v59  ;;  %v2039_v37 = vld [vmem:[%s2542_s2 + $0x8] sm:$0xff] }
 0x399   :  { %v2408_v36 = vadd.f32 %v953_v31, %v952_v56  ;;  %v941_v27 = vadd.f32 %v1970_v30, %v940_v39 }
 0x39b   :  { %1973 = vtanh.f32 %v2408_v36  ;;  %v945_v42 = vsel %vm944_vm14, %v1970_v30, %v941_v27 }
 0x39c   :  { %v950_v23 = vsel %vm947_vm15, %v949_v47, %v945_v42 }
 0x3a1   :  { %v1974_v0 = vpop.eup %1973 }
 0x3a2   :  { %v956_v9 = vmul.f32 %v1974_v0, %v950_v23 }
 0x3a4   :  { %v957_v22 = vpack.c.bf16 %v956_v9, %v956_v9 }
 0x3a6   :  { %1760 = vmatmul.msk.bf16.vlgmr.msra.gmra.mxu0 %vm81_vm0, %v957_v22  ;;  %1761 = vmatmul.msk.bf16.vlgmr.msra.gmra.mxu1 %vm81_vm0, %v957_v22 }
 0x3a7   :  { %1762 = vmatmul.msk.bf16.vlgmr.msra.gmra.mxu2 %vm81_vm0, %v957_v22  ;;  %1763 = vmatmul.msk.bf16.vlgmr.msra.gmra.mxu3 %vm81_vm0, %v957_v22 }
 0x3a8   :  { %1213 = vmatpush.bf16.msra.mxu0 %v2039_v37  ;;  %1227 = vmatpush.bf16.msra.mxu1 %v2040_v10 }
 0x3a9   :  { %1255 = vmatpush.bf16.msra.mxu3 %v2041_v11  ;;  %1241 = vmatpush.bf16.msra.mxu2 %v2042_v12 }
 0x3ac   :  { %1214 = vmatpush.bf16.msra.mxu0 %v2043_v13  ;;  %1228 = vmatpush.bf16.msra.mxu1 %v2044_v3 }
 0x3ad   :  { %1242 = vmatpush.bf16.msra.mxu2 %v2045_v14  ;;  %1256 = vmatpush.bf16.msra.mxu3 %v2046_v8 }
 0x423   :  { %v970_v16 = vpop.f32.mrf.mxu0  ;;  %v984_v19 = vpop.f32.mrf.mxu1 }
 0x424   :  { %v974_v15 = vadd.f32 %v970_v16, %v2281_v57  ;;  %v988_v29 = vadd.f32 %v984_v19, %v2284_v58 }
 0x426   :  { %v1764_v49 = vmul.f32 -1.442695, %v974_v15  ;;  %v1765_v50 = vmul.f32 -1.442695, %v988_v29 }
 0x428   :  { %1975 = vpow2.f32 %v1764_v49 }
 0x429   :  { %1977 = vpow2.f32 %v1765_v50 }
 0x42a   :  { %v998_v46 = vpop.f32.mrf.mxu2  ;;  %v1012_v35 = vpop.f32.mrf.mxu3 }
 0x42b   :  { %v1016_v20 = vadd.f32 %v1012_v35, %v2290_v62  ;;  %v972_v24 = vpop.f32.mrf.mxu0  ;;  %v986_v43 = vpop.f32.mrf.mxu1  ;;  %v1002_v32 = vadd.f32 %v998_v46, %v2287_v61 }
 0x42d   :  { %v1766_v48 = vmul.f32 -1.442695, %v1016_v20 }
 0x42e   :  { %v1976_v54 = vpop.eup %1975 }
 0x42f   :  { %v1978_v25 = vpop.eup %1977  ;;  %v1020_v33 = vadd.f32 1.0, %v1976_v54  ;;  %1979 = vpow2.f32 %v1766_v48 }
 0x430   :  { %v1039_v34 = vadd.f32 1.0, %v1978_v25 }
 0x431   :  { %1981 = vrcp.f32 %v1020_v33  ;;  %v1032_v52 = vand.u32 2147483648, %v1020_v33  ;;  %v1030_v44 = vand.u32 2147483647, %v1020_v33  ;;  %vm1026_vm3 = vweird.f32 %v1020_v33 }
 0x432   :  { %1983 = vrcp.f32 %v1039_v34  ;;  %v1000_v57 = vpop.f32.mrf.mxu2  ;;  %v1014_v58 = vpop.f32.mrf.mxu3  ;;  %v1051_v40 = vand.u32 2147483648, %v1039_v34  ;;  %v1049_v60 = vand.u32 2147483647, %v1039_v34  ;;  %vm1045_vm4 = vweird.f32 %v1039_v34 }
 0x433   :  { %v1033_v61 = vor.u32 1.1754944e-38, %v1032_v52  ;;  %vm1031_vm7 = vcmp.eq.f32.partialorder %v1030_v44, 8.507059e+37  ;;  %v1874_v57 = vld [vmem:[%s2544_s4 + $0x8] sm:$0xff]  ;;  %v1880_v58 = vld [vmem:[%s2544_s4 + $0x38] sm:$0xff] }
 0x434   :  { %v1052_v56 = vor.u32 1.1754944e-38, %v1051_v40  ;;  %vm1050_vm8 = vcmp.eq.f32.partialorder %v1049_v60, 8.507059e+37 }
 0x435   :  { %v1980_v51 = vpop.eup %1979 }
 0x436   :  { %v1059_v7 = vadd.f32 1.0, %v1980_v51 }
 0x437   :  { %v1982_v45 = vpop.eup %1981 }
 0x438   :  { %v1984_v21 = vpop.eup %1983  ;;  %v1022_v30 = vmul.f32 %v1982_v45, %v1020_v33  ;;  %1985 = vrcp.f32 %v1059_v7  ;;  %vm1027_vm1 = vweird.f32 %v1982_v45  ;;  %v1071_v10 = vand.u32 2147483648, %v1059_v7 }
 0x439   :  { %v1041_v62 = vmul.f32 %v1984_v21, %v1039_v34  ;;  %1987 = vtanh.f32 %v1002_v32  ;;  %vm1046_vm2 = vweird.f32 %v1984_v21  ;;  %vm1028_vm5 = vmor %vm1026_vm3, %vm1027_vm1  ;;  %vm1065_vm10 = vweird.f32 %v1059_v7  ;;  %v1878_v32 = vld [vmem:[%s2544_s4 + $0x28] sm:$0xff] }
 0x43a   :  { %v1023_v26 = vsub.f32 1.0, %v1022_v30  ;;  %vm1047_vm6 = vmor %vm1045_vm4, %vm1046_vm2  ;;  %v1069_v11 = vand.u32 2147483647, %v1059_v7  ;;  %v1072_v13 = vor.u32 1.1754944e-38, %v1071_v10  ;;  %v1879_v30 = vld [vmem:[%s2544_s4 + $0x30] sm:$0xff] }
 0x43b   :  { %v1042_v53 = vsub.f32 1.0, %v1041_v62 }
 0x43c   :  { %v1024_v4 = vmul.f32 %v1982_v45, %v1023_v26  ;;  %vm1070_vm12 = vcmp.eq.f32.partialorder %v1069_v11, 8.507059e+37 }
 0x43d   :  { %v1043_v55 = vmul.f32 %v1984_v21, %v1042_v53 }
 0x43e   :  { %v1986_v63 = vpop.eup %1985  ;;  %v1025_v59 = vadd.f32 %v1982_v45, %v1024_v4 }
 0x43f   :  { %v1044_v38 = vadd.f32 %v1984_v21, %v1043_v55  ;;  %v1061_v31 = vmul.f32 %v1986_v63, %v1059_v7  ;;  %v1988_v27 = vpop.eup %1987  ;;  %vm1066_vm9 = vweird.f32 %v1986_v63  ;;  %v1873_v7 = vld [vmem:[%s2544_s4] sm:$0xff] }
 0x440   :  { %v1029_v39 = vsel %vm1028_vm5, %v1982_v45, %v1025_v59  ;;  %vm1067_vm11 = vmor %vm1065_vm10, %vm1066_vm9  ;;  %v1875_v45 = vld [vmem:[%s2544_s4 + $0x10] sm:$0xff] }
 0x441   :  { %v1034_v41 = vsel %vm1031_vm7, %v1033_v61, %v1029_v39  ;;  %v1048_v28 = vsel %vm1047_vm6, %v1984_v21, %v1044_v38  ;;  %v1062_v42 = vsub.f32 1.0, %v1061_v31 }
 0x442   :  { %v1053_v47 = vsel %vm1050_vm8, %v1052_v56, %v1048_v28  ;;  %v1076_v0 = vmul.f32 %v1988_v27, %v1034_v41 }
 0x443   :  { %v1075_v23 = vmul.f32 %v1053_v47, %v2408_v36  ;;  %v1063_v9 = vmul.f32 %v1986_v63, %v1062_v42 }
 0x445   :  { %v2444_v22 = vadd.f32 %v1076_v0, %v1075_v23  ;;  %v1064_v37 = vadd.f32 %v1986_v63, %v1063_v9 }
 0x447   :  { %1989 = vtanh.f32 %v2444_v22  ;;  %v1068_v12 = vsel %vm1067_vm11, %v1986_v63, %v1064_v37 }
 0x448   :  { %v1073_v14 = vsel %vm1070_vm12, %v1072_v13, %v1068_v12  ;;  %v1877_v12 = vld [vmem:[%s2544_s4 + $0x20] sm:$0xff] }
 0x44d   :  { %v1990_v3 = vpop.eup %1989 }
 0x44e   :  { %v1079_v8 = vmul.f32 %v1990_v3, %v1073_v14 }
 0x450   :  { %v1080_v16 = vpack.c.bf16 %v1079_v8, %v1079_v8 }
 0x452   :  { %1767 = vmatmul.msk.bf16.vlgmr.msrb.gmra.mxu0 %vm81_vm0, %v1080_v16  ;;  %1768 = vmatmul.msk.bf16.vlgmr.msrb.gmra.mxu1 %vm81_vm0, %v1080_v16 }
 0x453   :  { %1769 = vmatmul.msk.bf16.vlgmr.msrb.gmra.mxu2 %vm81_vm0, %v1080_v16  ;;  %1770 = vmatmul.msk.bf16.vlgmr.msrb.gmra.mxu3 %vm81_vm0, %v1080_v16 }
 0x454   :  { %1355 = vmatpush.bf16.msrb.mxu0 %v1874_v57  ;;  %1460 = vmatpush.bf16.msrb.mxu3 %v1880_v58  ;;  %v1882_v57 = vld [vmem:[%s2546_s6 + $0x8] sm:$0xff] }
 0x455   :  { %1425 = vmatpush.bf16.msrb.mxu2 %v1878_v32 }
 0x458   :  { %1356 = vmatpush.bf16.msrb.mxu0 %v1873_v7  ;;  %1461 = vmatpush.bf16.msrb.mxu3 %v1879_v30  ;;  %v1891_v7 = vld [vmem:[%s2545_s5 + $0x1] ss:$0 sm:$0xff] }
 0x459   :  { %1426 = vmatpush.bf16.msrb.mxu2 %v1877_v12 }
 0x4cf   :  { %v1093_v36 = vpop.f32.mrf.mxu0  ;;  %v1107_v19 = vpop.f32.mrf.mxu1 }
 0x4d0   :  { %v1097_v15 = vadd.f32 %v1093_v36, %v2293_v1  ;;  %v1111_v29 = vadd.f32 %v1107_v19, %v2296_v2 }
 0x4d2   :  { %v1771_v49 = vmul.f32 -1.442695, %v1097_v15  ;;  %v1772_v50 = vmul.f32 -1.442695, %v1111_v29 }
 0x4d4   :  { %1991 = vpow2.f32 %v1771_v49  ;;  %v40_v49 = vld [vmem:[%s2541_s0 + $0x1c] sm:$0xf] }
 0x4d5   :  { %1993 = vpow2.f32 %v1772_v50 }
 0x4d6   :  { %v1121_v46 = vpop.f32.mrf.mxu2  ;;  %v1135_v35 = vpop.f32.mrf.mxu3 }
 0x4d7   :  { %v1139_v20 = vadd.f32 %v1135_v35, %v2302_v6  ;;  %v1095_v24 = vpop.f32.mrf.mxu0  ;;  %v1109_v43 = vpop.f32.mrf.mxu1  ;;  %v1876_v6 = vld [vmem:[%s2544_s4 + $0x18] sm:$0xff]  ;;  %v1125_v26 = vadd.f32 %v1121_v46, %v2299_v5 }
 0x4d8   :  { %1390 = vmatpush.bf16.msrb.mxu1 %v1876_v6 }
 0x4d9   :  { %v1773_v48 = vmul.f32 -1.442695, %v1139_v20 }
 0x4da   :  { %v1992_v54 = vpop.eup %1991 }
 0x4db   :  { %v1994_v25 = vpop.eup %1993  ;;  %v1143_v33 = vadd.f32 1.0, %v1992_v54  ;;  %1995 = vpow2.f32 %v1773_v48 }
 0x4dc   :  { %v1162_v34 = vadd.f32 1.0, %v1994_v25  ;;  %1391 = vmatpush.bf16.msrb.mxu1 %v1875_v45  ;;  %v2552_v25 = vld [vmem:[#allocation3_spill] sm:$0xff]  ;;  %v1881_v45 = vld [vmem:[%s2546_s6] sm:$0xff] }
 0x4dd   :  { %1997 = vrcp.f32 %v1143_v33  ;;  %v1155_v55 = vand.u32 2147483648, %v1143_v33  ;;  %v1153_v59 = vand.u32 2147483647, %v1143_v33  ;;  %vm1149_vm15 = vweird.f32 %v1143_v33 }
 0x4de   :  { %1999 = vrcp.f32 %v1162_v34  ;;  %v1123_v1 = vpop.f32.mrf.mxu2  ;;  %v1137_v2 = vpop.f32.mrf.mxu3  ;;  %v1174_v60 = vand.u32 2147483648, %v1162_v34  ;;  %v1172_v38 = vand.u32 2147483647, %v1162_v34  ;;  %vm1168_vm1 = vweird.f32 %v1162_v34 }
 0x4df   :  { %v1156_v56 = vor.u32 1.1754944e-38, %v1155_v55  ;;  %vm1154_vm4 = vcmp.eq.f32.partialorder %v1153_v59, 8.507059e+37 }
 0x4e0   :  { %v1175_v41 = vor.u32 1.1754944e-38, %v1174_v60  ;;  %vm1173_vm5 = vcmp.eq.f32.partialorder %v1172_v38, 8.507059e+37  ;;  %v1892_v38 = vld [vmem:[%s2545_s5 + $0x3] ss:$0 sm:$0xff] }
 0x4e1   :  { %v1996_v51 = vpop.eup %1995 }
 0x4e2   :  { %v1182_v21 = vadd.f32 1.0, %v1996_v51  ;;  %v1890_v51 = vld [vmem:[%s2545_s5] ss:$0 sm:$0xff] }
 0x4e3   :  { %v1998_v62 = vpop.eup %1997 }
 0x4e4   :  { %v2000_v53 = vpop.eup %1999  ;;  %v1145_v52 = vmul.f32 %v1998_v62, %v1143_v33  ;;  %2001 = vrcp.f32 %v1182_v21  ;;  %vm1150_vm13 = vweird.f32 %v1998_v62  ;;  %v1194_v14 = vand.u32 2147483648, %v1182_v21 }
 0x4e5   :  { %v1164_v40 = vmul.f32 %v2000_v53, %v1162_v34  ;;  %2003 = vtanh.f32 %v1125_v26  ;;  %vm1169_vm14 = vweird.f32 %v2000_v53  ;;  %vm1151_vm2 = vmor %vm1149_vm15, %vm1150_vm13  ;;  %vm1188_vm7 = vweird.f32 %v1182_v21 }
 0x4e6   :  { %v1146_v4 = vsub.f32 1.0, %v1145_v52  ;;  %vm1170_vm3 = vmor %vm1168_vm1, %vm1169_vm14  ;;  %v1192_v8 = vand.u32 2147483647, %v1182_v21  ;;  %v1195_v36 = vor.u32 1.1754944e-38, %v1194_v14 }
 0x4e7   :  { %v1165_v44 = vsub.f32 1.0, %v1164_v40  ;;  %v2553_v40 = vld [vmem:[#allocation2_spill] sm:$0xff] }
 0x4e8   :  { %v1147_v63 = vmul.f32 %v1998_v62, %v1146_v4  ;;  %vm1193_vm9 = vcmp.eq.f32.partialorder %v1192_v8, 8.507059e+37 }
 0x4e9   :  { %v1166_v61 = vmul.f32 %v2000_v53, %v1165_v44 }
 0x4ea   :  { %v2002_v5 = vpop.eup %2001  ;;  %v1148_v31 = vadd.f32 %v1998_v62, %v1147_v63 }
 0x4eb   :  { %v1167_v39 = vadd.f32 %v2000_v53, %v1166_v61  ;;  %v1184_v27 = vmul.f32 %v2002_v5, %v1182_v21  ;;  %v2004_v42 = vpop.eup %2003  ;;  %vm1189_vm6 = vweird.f32 %v2002_v5 }
 0x4ec   :  { %v1152_v28 = vsel %vm1151_vm2, %v1998_v62, %v1148_v31  ;;  %vm1190_vm8 = vmor %vm1188_vm7, %vm1189_vm6 }
 0x4ed   :  { %v1157_v47 = vsel %vm1154_vm4, %v1156_v56, %v1152_v28  ;;  %v1171_v0 = vsel %vm1170_vm3, %v2000_v53, %v1167_v39  ;;  %v1185_v23 = vsub.f32 1.0, %v1184_v27 }
 0x4ee   :  { %v1176_v9 = vsel %vm1173_vm5, %v1175_v41, %v1171_v0  ;;  %v1199_v37 = vmul.f32 %v2004_v42, %v1157_v47 }
 0x4ef   :  { %v1198_v10 = vmul.f32 %v1176_v9, %v2444_v22  ;;  %v1186_v11 = vmul.f32 %v2002_v5, %v1185_v23 }
 0x4f1   :  { %v2480_v13 = vadd.f32 %v1199_v37, %v1198_v10  ;;  %v1187_v3 = vadd.f32 %v2002_v5, %v1186_v11  ;;  %v1884_v11 = vld [vmem:[%s2547_s7 + $0x8] sm:$0xff] }
 0x4f3   :  { %2005 = vtanh.f32 %v2480_v13  ;;  %v1191_v16 = vsel %vm1190_vm8, %v2002_v5, %v1187_v3 }
 0x4f4   :  { %v1196_v19 = vsel %vm1193_vm9, %v1195_v36, %v1191_v16 }
 0x4f9   :  { %v2006_v22 = vpop.eup %2005 }
 0x4fa   :  { %v1202_v15 = vmul.f32 %v2006_v22, %v1196_v19 }
 0x4fc   :  { %v1203_v29 = vpack.c.bf16 %v1202_v15, %v1202_v15 }
 0x4fe   :  { %1774 = vmatmul.msk.bf16.vlgmr.msra.gmra.mxu0 %vm81_vm0, %v1203_v29  ;;  %1775 = vmatmul.msk.bf16.vlgmr.msra.gmra.mxu1 %vm81_vm0, %v1203_v29 }
 0x4ff   :  { %1776 = vmatmul.msk.bf16.vlgmr.msra.gmra.mxu2 %vm81_vm0, %v1203_v29  ;;  %1777 = vmatmul.msk.bf16.vlgmr.msra.gmra.mxu3 %vm81_vm0, %v1203_v29 }
 0x500   :  { %1589 = vmatpush.bf16.msra.mxu1 %v1882_v57  ;;  %1561 = vmatpush.bf16.msra.mxu0 %v1884_v11 }
 0x504   :  { %1590 = vmatpush.bf16.msra.mxu1 %v1881_v45 }
 0x50e   :  { %1789 = vmatmul.msk.bf16.vlgmr.msrb.gmra.mxu0 %vm81_vm0, %v40_v49  ;;  %1803 = vmatmul.msk.bf16.vlgmr.msrb.gmra.mxu1 %vm81_vm0, %v40_v49 }
 0x50f   :  { %1831 = vmatmul.msk.bf16.vlgmr.msrb.gmra.mxu3 %vm81_vm0, %v40_v49  ;;  %1817 = vmatmul.msk.bf16.vlgmr.msrb.gmra.mxu2 %vm81_vm0, %v40_v49  ;;  %v1883_v49 = vld [vmem:[%s2547_s7] sm:$0xff] }
 0x510   :  { %1562 = vmatpush.bf16.msra.mxu0 %v1883_v49 }
 0x57b   :  { %v1216_v50 = vpop.f32.mrf.mxu0  ;;  %v1230_v46 = vpop.f32.mrf.mxu1 }
 0x57c   :  { %v1220_v35 = vadd.f32 %v1216_v50, %v2305_v17  ;;  %v1234_v20 = vadd.f32 %v1230_v46, %v2308_v18 }
 0x57e   :  { %v1778_v24 = vmul.f32 -1.442695, %v1220_v35  ;;  %v1779_v43 = vmul.f32 -1.442695, %v1234_v20 }
 0x580   :  { %2007 = vpow2.f32 %v1778_v24 }
 0x581   :  { %2009 = vpow2.f32 %v1779_v43 }
 0x582   :  { %v1244_v48 = vpop.f32.mrf.mxu2  ;;  %v1258_v54 = vpop.f32.mrf.mxu3 }
 0x583   :  { %v1262_v33 = vadd.f32 %v1258_v54, %v2552_v25  ;;  %v1218_v34 = vpop.f32.mrf.mxu0  ;;  %v1232_v1 = vpop.f32.mrf.mxu1  ;;  %v1248_v4 = vadd.f32 %v1244_v48, %v2553_v40 }
 0x585   :  { %v1780_v2 = vmul.f32 -1.442695, %v1262_v33 }
 0x586   :  { %v2008_v6 = vpop.eup %2007 }
 0x587   :  { %v2010_v58 = vpop.eup %2009  ;;  %v1266_v17 = vadd.f32 1.0, %v2008_v6  ;;  %2011 = vpow2.f32 %v1780_v2  ;;  %v1893_v2 = vld [vmem:[%s2545_s5 + $0x2] ss:$0 sm:$0xff] }
 0x588   :  { %v1285_v18 = vadd.f32 1.0, %v2010_v58 }
 0x589   :  { %2013 = vrcp.f32 %v1266_v17  ;;  %v1276_v56 = vand.u32 2147483647, %v1266_v17  ;;  %v1278_v42 = vand.u32 2147483648, %v1266_v17  ;;  %vm1272_vm13 = vweird.f32 %v1266_v17 }
 0x58a   :  { %2015 = vrcp.f32 %v1285_v18  ;;  %v1246_v32 = vpop.f32.mrf.mxu2  ;;  %v1260_v21 = vpop.f32.mrf.mxu3  ;;  %v1297_v28 = vand.u32 2147483648, %v1285_v18  ;;  %v1295_v9 = vand.u32 2147483647, %v1285_v18  ;;  %vm1291_vm12 = vweird.f32 %v1285_v18 }
 0x58b   :  { %v1358_v30 = vpop.f32.mrf.mxu0  ;;  %v1393_v62 = vpop.f32.mrf.mxu1  ;;  %vm1277_vm15 = vcmp.eq.f32.partialorder %v1276_v56, 8.507059e+37  ;;  %v1279_v16 = vor.u32 1.1754944e-38, %v1278_v42 }
 0x58c   :  { %v1359_v26 = vadd.f32 %v1890_v51, %v1358_v30  ;;  %v1394_v53 = vadd.f32 %v1891_v7, %v1393_v62  ;;  %v1298_v15 = vor.u32 1.1754944e-38, %v1297_v28  ;;  %vm1296_vm2 = vcmp.eq.f32.partialorder %v1295_v9, 8.507059e+37 }
 0x58d   :  { %v2012_v52 = vpop.eup %2011 }
 0x58e   :  { %v2510_v44 = vadd.f32 1.0, %v2012_v52  ;;  %v1832_v55 = vmul.f32 -1.442695, %v1359_v26  ;;  %v1833_v63 = vmul.f32 -1.442695, %v1394_v53 }
 0x58f   :  { %v2014_v60 = vpop.eup %2013 }
 0x590   :  { %v2016_v59 = vpop.eup %2015  ;;  %v1268_v61 = vmul.f32 %v2014_v60, %v1266_v17  ;;  %2017 = vrcp.f32 %v2510_v44  ;;  %vm1273_vm10 = vweird.f32 %v2014_v60  ;;  %v1317_v17 = vand.u32 2147483648, %v2510_v44 }
 0x591   :  { %v1287_v5 = vmul.f32 %v2016_v59, %v1285_v18  ;;  %2019 = vtanh.f32 %v1248_v4  ;;  %vm1292_vm11 = vweird.f32 %v2016_v59  ;;  %vm1274_vm14 = vmor %vm1272_vm13, %vm1273_vm10  ;;  %vm1311_vm4 = vweird.f32 %v2510_v44 }
 0x592   :  { %v1269_v31 = vsub.f32 1.0, %v1268_v61  ;;  %2021 = vpow2.f32 %v1832_v55  ;;  %v1463_v39 = vpop.f32.mrf.mxu3  ;;  %v1428_v27 = vpop.f32.mrf.mxu2  ;;  %vm1293_vm1 = vmor %vm1291_vm12, %vm1292_vm11  ;;  %v1318_v30 = vor.u32 1.1754944e-38, %v1317_v17 }
 0x593   :  { %v1288_v41 = vsub.f32 1.0, %v1287_v5  ;;  %2023 = vpow2.f32 %v1833_v63  ;;  %v1360_v47 = vpop.f32.mrf.mxu0  ;;  %v1395_v0 = vpop.f32.mrf.mxu1  ;;  %v1464_v37 = vadd.f32 %v1892_v38, %v1463_v39  ;;  %v1429_v51 = vadd.f32 %v1893_v2, %v1428_v27 }
 0x594   :  { %v1270_v23 = vmul.f32 %v2014_v60, %v1269_v31 }
 0x595   :  { %v1289_v10 = vmul.f32 %v2016_v59, %v1288_v41  ;;  %v1834_v14 = vmul.f32 -1.442695, %v1464_v37 }
 0x596   :  { %v2018_v12 = vpop.eup %2017  ;;  %v1271_v3 = vadd.f32 %v2014_v60, %v1270_v23 }
 0x597   :  { %v2020_v8 = vpop.eup %2019  ;;  %v1290_v36 = vadd.f32 %v2016_v59, %v1289_v10  ;;  %v1307_v22 = vmul.f32 %v2018_v12, %v2510_v44  ;;  %2025 = vpow2.f32 %v1834_v14  ;;  %vm1312_vm3 = vweird.f32 %v2018_v12 }
 0x598   :  { %v2022_v19 = vpop.eup %2021  ;;  %v1275_v29 = vsel %vm1274_vm14, %v2014_v60, %v1271_v3  ;;  %vm1313_vm5 = vmor %vm1311_vm4, %vm1312_vm3 }
 0x599   :  { %v2024_v50 = vpop.eup %2023  ;;  %v1280_v46 = vsel %vm1277_vm15, %v1279_v16, %v1275_v29  ;;  %v1294_v35 = vsel %vm1293_vm1, %v2016_v59, %v1290_v36  ;;  %v1308_v20 = vsub.f32 1.0, %v1307_v22  ;;  %v1470_v24 = vadd.f32 1.0, %v2022_v19 }
 0x59a   :  { %v1299_v43 = vsel %vm1296_vm2, %v1298_v15, %v1294_v35  ;;  %v1322_v48 = vmul.f32 %v2020_v8, %v1280_v46  ;;  %v1489_v54 = vadd.f32 1.0, %v2024_v50  ;;  %v1465_v25 = vpop.f32.mrf.mxu3  ;;  %v1430_v33 = vpop.f32.mrf.mxu2  ;;  %v1894_v46 = vld [vmem:[%s2548_s8] ss:$0 sm:$0xff] }
 0x59b   :  { %v1321_v34 = vmul.f32 %v1299_v43, %v2480_v13  ;;  %v1309_v1 = vmul.f32 %v2018_v12, %v1308_v20  ;;  %2027 = vrcp.f32 %v1470_v24  ;;  %v1315_v13 = vand.u32 2147483647, %v2510_v44 }
 0x59c   :  { %2029 = vrcp.f32 %v1489_v54  ;;  %v1501_v4 = vand.u32 2147483648, %v1489_v54  ;;  %v1482_v55 = vand.u32 2147483648, %v1470_v24  ;;  %v1480_v63 = vand.u32 2147483647, %v1470_v24 }
 0x59d   :  { %v1323_v57 = vadd.f32 %v1322_v48, %v1321_v34  ;;  %v2026_v6 = vpop.eup %2025  ;;  %v1310_v58 = vadd.f32 %v2018_v12, %v1309_v1  ;;  %vm1316_vm6 = vcmp.eq.f32.partialorder %v1315_v13, 8.507059e+37  ;;  %v1499_v38 = vand.u32 2147483647, %v1489_v54 }
 0x59e   :  { %v1509_v18 = vadd.f32 1.0, %v2026_v6  ;;  %vm1476_vm9 = vweird.f32 %v1470_v24  ;;  %vm1495_vm10 = vweird.f32 %v1489_v54  ;;  %v1483_v27 = vor.u32 1.1754944e-38, %v1482_v55 }
 0x59f   :  { %2031 = vtanh.f32 %v1323_v57  ;;  %v1314_v32 = vsel %vm1313_vm5, %v2018_v12, %v1310_v58  ;;  %v1502_v28 = vor.u32 1.1754944e-38, %v1501_v4  ;;  %vm1481_vm12 = vcmp.eq.f32.partialorder %v1480_v63, 8.507059e+37 }
 0x5a0   :  { %2033 = vrcp.f32 %v1509_v18  ;;  %v1319_v52 = vsel %vm1316_vm6, %v1318_v30, %v1314_v32  ;;  %vm1500_vm14 = vcmp.eq.f32.partialorder %v1499_v38, 8.507059e+37  ;;  %v1521_v14 = vand.u32 2147483648, %v1509_v18 }
 0x5a1   :  { %v2028_v7 = vpop.eup %2027  ;;  %2035 = vtanh.f32 %v1429_v51  ;;  %vm1515_vm1 = vweird.f32 %v1509_v18  ;;  %v1519_v8 = vand.u32 2147483647, %v1509_v18 }
 0x5a2   :  { %v2030_v45 = vpop.eup %2029  ;;  %v1472_v21 = vmul.f32 %v2028_v7, %v1470_v24  ;;  %vm1477_vm7 = vweird.f32 %v2028_v7  ;;  %v1522_v36 = vor.u32 1.1754944e-38, %v1521_v14 }
 0x5a3   :  { %v1491_v62 = vmul.f32 %v2030_v45, %v1489_v54  ;;  %vm1496_vm8 = vweird.f32 %v2030_v45  ;;  %vm1478_vm11 = vmor %vm1476_vm9, %vm1477_vm7  ;;  %vm1520_vm3 = vcmp.eq.f32.partialorder %v1519_v8, 8.507059e+37 }
 0x5a4   :  { %v1473_v26 = vsub.f32 1.0, %v1472_v21  ;;  %vm1497_vm13 = vmor %vm1495_vm10, %vm1496_vm8 }
 0x5a5   :  { %v2032_v53 = vpop.eup %2031  ;;  %v1492_v40 = vsub.f32 1.0, %v1491_v62 }
 0x5a6   :  { %v1474_v60 = vmul.f32 %v2028_v7, %v1473_v26  ;;  %v1325_v44 = vmul.f32 %v2032_v53, %v1319_v52  ;;  %v2034_v59 = vpop.eup %2033 }
 0x5a7   :  { %v1493_v61 = vmul.f32 %v2030_v45, %v1492_v40  ;;  %v1511_v5 = vmul.f32 %v2034_v59, %v1509_v18  ;;  %v2036_v39 = vpop.eup %2035  ;;  %vm1516_vm15 = vweird.f32 %v2034_v59 }
 0x5a8   :  { %v1475_v31 = vadd.f32 %v2028_v7, %v1474_v60  ;;  %v1530_v56 = vpack.c.bf16 %v1325_v44, %v1325_v44  ;;  %vm1517_vm2 = vmor %vm1515_vm1, %vm1516_vm15 }
 0x5a9   :  { %v1494_v41 = vadd.f32 %v2030_v45, %v1493_v61  ;;  %v1512_v42 = vsub.f32 1.0, %v1511_v5 }
 0x5aa   :  { %v1479_v47 = vsel %vm1478_vm11, %v2028_v7, %v1475_v31  ;;  %1852 = vmatmul.msk.bf16.vlgmr.msra.gmra.mxu1 %vm81_vm0, %v1530_v56 }
 0x5ab   :  { %v1484_v0 = vsel %vm1481_vm12, %v1483_v27, %v1479_v47  ;;  %v1498_v23 = vsel %vm1497_vm13, %v2030_v45, %v1494_v41  ;;  %v1513_v9 = vmul.f32 %v2034_v59, %v1512_v42 }
 0x5ac   :  { %v1503_v37 = vsel %vm1500_vm14, %v1502_v28, %v1498_v23  ;;  %v1526_v10 = vmul.f32 %v2036_v39, %v1484_v0 }
 0x5ad   :  { %v1525_v11 = vmul.f32 0.0, %v1503_v37  ;;  %v1514_v3 = vadd.f32 %v2034_v59, %v1513_v9 }
 0x5af   :  { %v1527_v12 = vadd.f32 %v1526_v10, %v1525_v11  ;;  %v1518_v16 = vsel %vm1517_vm2, %v2034_v59, %v1514_v3 }
 0x5b0   :  { %v1523_v19 = vsel %vm1520_vm3, %v1522_v36, %v1518_v16 }
 0x5b1   :  { %2037 = vtanh.f32 %v1527_v12 }
 0x5b7   :  { %v2038_v22 = vpop.eup %2037 }
 0x5b8   :  { %v1529_v15 = vmul.f32 %v2038_v22, %v1523_v19 }
 0x5ba   :  { %v1535_v29 = vpack.c.bf16 %v1529_v15, %v1529_v15 }
 0x5bc   :  { %1843 = vmatmul.msk.bf16.vlgmr.msra.gmra.mxu0 %vm81_vm0, %v1535_v29 }
 0x627   :  { %v1592_v49 = vpop.f32.mrf.mxu1 }
 0x62f   :  { %v1594_v50 = vpop.f32.mrf.mxu1 }
 0x639   :  { %v1564_v35 = vpop.f32.mrf.mxu0 }
 0x63a   :  { %v1593_v20 = vadd.f32 %v1592_v49, %v1564_v35 }
 0x63c   :  { %v1600_v24 = vadd.f32 %v1894_v46, %v1593_v20 }
 0x63e   :  { %1601 = vst [vmem:[%s2549_s9] sm:$0xff] %v1600_v24 }
 0x641   :  { %v1566_v43 = vpop.f32.mrf.mxu0 }

</bundles_post_ra>
